<compile_context>
chip_gen: v7x
topology: tpu7x:2x2x1
jax: 0.10.0
libtpu: 0.0.40
codegen_flags: <defaults>
</compile_context>

<pallas_src>
import jax
import jax.numpy as jnp
from jax import lax
from jax.experimental import pallas as pl
from jax.experimental.pallas import tpu as pltpu

# ---------------- sizes ----------------
B = 2            # batch
S = 8            # input_ids sequence length
H = 32           # hidden size (== pooler dim == embedding dim == lstm hidden)
V = 64           # vocab size
T = 6            # target_len (answer_tokenized.shape[0])
C, IMG = 3, 16   # image channels / spatial
P = C * IMG * IMG                # 768 flattened pixels

SW = 128                         # decoder state width: [V one-hot | H hidden | 1 bias | pad]
HOFF = V                         # hidden lanes start (64)
BIAS_LANE = V + H                # constant-1 bias lane (96)
GOFF = 3 * H                     # start of the tanh (g) gate lanes (96)
KENC = 896                       # encoder contraction dim (H + 1 + P = 801 zero-padded to 7*128)

START_TOKEN = 1  # bos_token_id
PAD_TOKEN = 0    # pad_token_id


# -------- single fused kernel: encoder pooler fusion + full LSTM decode --------
def encdec_kernel(scal_ref,           # (T + T*B,) int32 SMEM: [tf_flags | answer tokens (T,B) row-major]
                  encx_ref,           # (B, KENC)   packed [text_mean | 1 | img_flat | 0]
                  encw_ref,           # (2H, KENC)  transposed fused pooler weight (+biases in col H)
                  wbig_ref,           # (SW, 4H)    fused gate weight (+bias row 96), gate order (i,f,o,g)
                  wout_ref,           # (SW, V)     output projection (+bias row 96)
                  out_ref):           # (B, T*V)    lane-dense logits
    col = lax.broadcasted_iota(jnp.int32, (B, SW), 1)
    row = lax.broadcasted_iota(jnp.int32, (B, SW), 0)
    colv = lax.broadcasted_iota(jnp.int32, (B, V), 1)
    h_mask = jnp.logical_and(col >= HOFF, col < BIAS_LANE)
    bias_lane = (col == BIAS_LANE).astype(jnp.float32)

    # ---- encoder: one transposed (lane-dense) matmul gives both pooler pre-activations ----
    pre = lax.dot_general(encx_ref[...], encw_ref[...],
                          dimension_numbers=(((1,), (1,)), ((), ())),
                          preferred_element_type=jnp.float32)          # (B, 2H)
    pooled = jnp.tanh(pre)
    enc = 0.5 * (pooled[:, :H] + pooled[:, H:2 * H])                   # (B, H) initial hidden

    # persistent 128-lane state [x one-hot | h | 1 | 0]; c kept in the same lane layout
    state = (jnp.concatenate([jnp.zeros((B, HOFF), jnp.float32), enc,
                              jnp.zeros((B, SW - HOFF - H), jnp.float32)], axis=1)
             + (col == START_TOKEN).astype(jnp.float32) + bias_lane)
    c = jnp.zeros((B, SW), jnp.float32)

    for t in range(T):                                   # static unroll of the recurrence
        # one fused gate matmul: gates lanes = [i | f | o | g]; bias rides in row 96
        gates = jnp.dot(state, wbig_ref[...], preferred_element_type=jnp.float32)  # (B, 4H)
        act = jnp.where(col >= GOFF, jnp.tanh(gates), jax.nn.sigmoid(gates))

        # align i/f/g onto the hidden lanes with XLU rolls (o is already aligned)
        i_g = pltpu.roll(act, 2 * H, axis=1)
        f_g = pltpu.roll(act, H, axis=1)
        g_g = pltpu.roll(act, SW - H, axis=1)
        c = f_g * c + i_g * g_g                          # hidden lanes meaningful, rest bounded
        h_raw = act * jnp.tanh(c)                        # o * tanh(c)
        hb = jnp.where(h_mask, h_raw, 0.0) + bias_lane   # [0 | h | 1 | 0]

        logits = jnp.dot(hb, wout_ref[...], preferred_element_type=jnp.float32)    # (B, V)
        out_ref[:, t * V:(t + 1) * V] = logits           # per-step lane store

        # greedy argmax (first-index tie-break, matches torch.argmax)
        mx = jnp.max(logits, axis=1, keepdims=True)
        first_idx = jnp.min(jnp.where(logits == mx, colv, V), axis=1, keepdims=True)
        greedy_oh = (col == first_idx).astype(jnp.float32)

        # teacher one-hot rebuilt from SMEM tokens (no (T,B,V) DMA)
        tok = jnp.zeros((B, SW), jnp.int32)
        for b in range(B):
            tok = jnp.where(row == b, scal_ref[T + t * B + b], tok)
        teacher_oh = (col == tok).astype(jnp.float32)

        x_next = jnp.where(scal_ref[t] == 1, teacher_oh, greedy_oh)
        state = hb + x_next                              # disjoint lane ranges


def encoder_rnn_forward(scal, enc_x, enc_w_t, w_big, w_out_big):
    grid_spec = pltpu.PrefetchScalarGridSpec(
        num_scalar_prefetch=1,
        grid=(1,),
        in_specs=[
            pl.BlockSpec((B, KENC), lambda i, s: (0, 0)),          # packed encoder input
            pl.BlockSpec((2 * H, KENC), lambda i, s: (0, 0)),      # fused pooler weight (transposed)
            pl.BlockSpec((SW, 4 * H), lambda i, s: (0, 0)),        # fused gate weight
            pl.BlockSpec((SW, V), lambda i, s: (0, 0)),            # output projection
        ],
        out_specs=pl.BlockSpec((B, T * V), lambda i, s: (0, 0)),
    )
    out_flat = pl.pallas_call(
        encdec_kernel,
        out_shape=jax.ShapeDtypeStruct((B, T * V), jnp.float32),
        grid_spec=grid_spec,
        compiler_params=pltpu.CompilerParams(dimension_semantics=("arbitrary",)),
    )(scal, enc_x, enc_w_t, w_big, w_out_big)
    # (B, T*V) -> (T, B, V) time-major, matching the PyTorch module
    return out_flat.reshape(B, T, V).transpose(1, 0, 2)


# ---------------- pure-JAX reference (for correctness check) ----------------
def reference_forward(input_ids, attention_mask, image, answer_tok, tf_flags, params):
    (emb_table, w_tp, b_tp, w_vp, b_vp, w_ih, w_hh, b_gates, w_out, b_out) = params
    mask = attention_mask.astype(jnp.float32)
    text_mean = (emb_table[input_ids] * mask[..., None]).sum(1) / jnp.maximum(
        mask.sum(1, keepdims=True), 1.0)
    img_flat = image.reshape(B, -1)
    enc = 0.5 * (jnp.tanh(text_mean @ w_tp + b_tp) + jnp.tanh(img_flat @ w_vp + b_vp))
    h, c = enc, jnp.zeros_like(enc)
    x = jnp.full((B,), START_TOKEN, jnp.int32)
    outs = []
    for t in range(T):
        e = emb_table[x]
        gates = e @ w_ih + h @ w_hh + b_gates     # PyTorch gate order (i, f, g, o)
        i_g = jax.nn.sigmoid(gates[:, :H]); f_g = jax.nn.sigmoid(gates[:, H:2 * H])
        g_g = jnp.tanh(gates[:, 2 * H:3 * H]); o_g = jax.nn.sigmoid(gates[:, 3 * H:])
        c = f_g * c + i_g * g_g
        h = o_g * jnp.tanh(c)
        logits = h @ w_out + b_out
        outs.append(logits)
        best = jnp.argmax(logits, axis=1).astype(jnp.int32)
        x = jnp.where(tf_flags[t] == 1, answer_tok[t], best)
    return jnp.stack(outs), enc


if __name__ == "__main__":
    key = jax.random.PRNGKey(0)
    ks = jax.random.split(key, 16)

    # forward() inputs
    input_ids = jax.random.randint(ks[0], (B, S), 0, V, dtype=jnp.int32)
    attention_mask = jnp.ones((B, S), jnp.int32).at[:, S - 2:].set(0)
    image = jax.random.normal(ks[1], (B, C, IMG, IMG), jnp.float32)        # NCHW like torch
    answer_tok = jax.random.randint(ks[2], (T, B), 0, V, dtype=jnp.int32)  # time-major
    teacher_force_ratio = 0.5
    # TODO(synk): torch uses Python random.random() per step; replaced by deterministic flags.
    tf_flags = (jax.random.uniform(ks[3], (T,)) < teacher_force_ratio).astype(jnp.int32)

    # deterministic synthetic parameters
    sc = 0.2
    emb_table = sc * jax.random.normal(ks[4], (V, H), jnp.float32)          # word embeddings
    w_tp = sc * jax.random.normal(ks[5], (H, H), jnp.float32)               # text pooler proxy
    b_tp = sc * jax.random.normal(ks[6], (1, H), jnp.float32)
    w_vp = sc * jax.random.normal(ks[7], (P, H), jnp.float32) / jnp.sqrt(P)  # vision pooler proxy
    b_vp = sc * jax.random.normal(ks[8], (1, H), jnp.float32)
    w_ih = sc * jax.random.normal(ks[9], (H, 4 * H), jnp.float32)           # LSTM input weights
    w_hh = sc * jax.random.normal(ks[10], (H, 4 * H), jnp.float32)          # LSTM hidden weights
    b_gates = sc * jax.random.normal(ks[11], (1, 4 * H), jnp.float32)       # b_ih + b_hh (pre-summed)
    w_out = sc * jax.random.normal(ks[12], (H, V), jnp.float32)             # vocab projection
    b_out = sc * jax.random.normal(ks[13], (1, V), jnp.float32)
    params = (emb_table, w_tp, b_tp, w_vp, b_vp, w_ih, w_hh, b_gates, w_out, b_out)

    # ---- glue: pooling proxies for the (untranslatable) pretrained encoders ----
    # TODO(synk): CLIP-fa vision/text transformers replaced by linear+tanh pooler proxies.
    mask = attention_mask.astype(jnp.float32)
    text_mean = (emb_table[input_ids] * mask[..., None]).sum(1) / jnp.maximum(
        mask.sum(1, keepdims=True), 1.0)
    img_flat = image.reshape(B, -1)

    # ---- fused kernel operands (biases folded, lane-dense layouts) ----
    # gate columns reordered from PyTorch (i, f, g, o) to (i, f, o, g)
    def reorder(w):
        return jnp.concatenate([w[:, :2 * H], w[:, 3 * H:], w[:, 2 * H:3 * H]], axis=1)

    # fused gate weight: rows 0:V = emb@W_ih, V:V+H = W_hh, row 96 = b_ih+b_hh, rest 0
    w_big = jnp.zeros((SW, 4 * H), jnp.float32)
    w_big = w_big.at[:V].set(reorder(emb_table @ w_ih))
    w_big = w_big.at[HOFF:HOFF + H].set(reorder(w_hh))
    w_big = w_big.at[BIAS_LANE].set(reorder(b_gates)[0])

    # output projection: rows 64:96 = W_out, row 96 = b_out, rest 0
    w_out_big = jnp.zeros((SW, V), jnp.float32)
    w_out_big = w_out_big.at[HOFF:HOFF + H].set(w_out)
    w_out_big = w_out_big.at[BIAS_LANE].set(b_out[0])

    # merged transposed pooler weight (2H, KENC): rows 0:H text branch, H:2H image branch;
    # contraction layout = [text_mean (H) | 1 (bias) | img_flat (P) | zero pad]
    enc_w_t = jnp.zeros((2 * H, KENC), jnp.float32)
    enc_w_t = enc_w_t.at[:H, :H].set(w_tp.T)
    enc_w_t = enc_w_t.at[:H, H].set(b_tp[0])
    enc_w_t = enc_w_t.at[H:, H].set(b_vp[0])
    enc_w_t = enc_w_t.at[H:, H + 1:H + 1 + P].set(w_vp.T)

    enc_x = jnp.zeros((B, KENC), jnp.float32)
    enc_x = enc_x.at[:, :H].set(text_mean)
    enc_x = enc_x.at[:, H].set(1.0)
    enc_x = enc_x.at[:, H + 1:H + 1 + P].set(img_flat)

    # single scalar-prefetch array: [tf flags (T) | answer tokens (T*B) row-major]
    scal = jnp.concatenate([tf_flags.astype(jnp.int32),
                            answer_tok.reshape(-1).astype(jnp.int32)])

    # ---- single fused Pallas kernel (encoder fusion + full decode loop) ----
    outputs = encoder_rnn_forward(scal, enc_x, enc_w_t, w_big, w_out_big)
    outputs = jax.block_until_ready(outputs)                                # (T, B, V)

    # ---- check vs pure-JAX reference ----
    ref_out, ref_enc = reference_forward(input_ids, attention_mask, image,
                                         answer_tok, tf_flags, params)
    assert outputs.shape == (T, B, V)
    assert bool(jnp.all(jnp.isfinite(outputs)))
    assert bool(jnp.allclose(outputs, ref_out, atol=2e-2, rtol=2e-2))
    print("KERNEL_OK")
</pallas_src>

<mosaic_0001>
module attributes {stable_mosaic.version = 11 : i64} {
  func.func @encdec_kernel(%arg0: i32, %arg1: memref<18xi32, #tpu.memory_space<smem>>, %arg2: memref<2x896xf32, #tpu.memory_space<vmem>>, %arg3: memref<64x896xf32, #tpu.memory_space<vmem>>, %arg4: memref<128x128xf32, #tpu.memory_space<vmem>>, %arg5: memref<128x64xf32, #tpu.memory_space<vmem>>, %arg6: memref<2x384xf32, #tpu.memory_space<vmem>>) attributes {dimension_semantics = [#tpu.dimension_semantics<arbitrary>], iteration_bounds = array<i64: 1>, scalar_prefetch = 1 : i64, scratch_operands = 0 : i64, tpu.core_type = #tpu.core_type<tc>, window_params = [{pipeline_mode = #tpu.pipeline_mode<synchronous>, transform_indices = @transform_0, window_bounds = array<i64: 2, 896>}, {pipeline_mode = #tpu.pipeline_mode<synchronous>, transform_indices = @transform_1, window_bounds = array<i64: 64, 896>}, {pipeline_mode = #tpu.pipeline_mode<synchronous>, transform_indices = @transform_2, window_bounds = array<i64: 128, 128>}, {pipeline_mode = #tpu.pipeline_mode<synchronous>, transform_indices = @transform_3, window_bounds = array<i64: 128, 64>}, {pipeline_mode = #tpu.pipeline_mode<synchronous>, transform_indices = @transform_4, window_bounds = array<i64: 2, 384>}]} {
    %0 = tpu.iota {dimensions = array<i32: 1>} : vector<2x128xi32>
    %1 = tpu.iota {dimensions = array<i32: 0>} : vector<2x128xi32>
    %2 = tpu.iota {dimensions = array<i32: 1>} : vector<2x64xi32>
    %c64_i32 = arith.constant 64 : i32
    %3 = vector.broadcast %c64_i32 : i32 to vector<2x128xi32>
    %4 = arith.cmpi sge, %0, %3 : vector<2x128xi32>
    %c96_i32 = arith.constant 96 : i32
    %5 = vector.broadcast %c96_i32 : i32 to vector<2x128xi32>
    %6 = arith.cmpi slt, %0, %5 : vector<2x128xi32>
    %7 = arith.andi %4, %6 : vector<2x128xi1>
    %c96_i32_0 = arith.constant 96 : i32
    %8 = vector.broadcast %c96_i32_0 : i32 to vector<2x128xi32>
    %9 = arith.cmpi eq, %0, %8 : vector<2x128xi32>
    %10 = arith.extui %9 : vector<2x128xi1> to vector<2x128xi32>
    %11 = arith.sitofp %10 : vector<2x128xi32> to vector<2x128xf32>
    %c0 = arith.constant 0 : index
    %c0_1 = arith.constant 0 : index
    %12 = vector.load %arg2[%c0, %c0_1] : memref<2x896xf32, #tpu.memory_space<vmem>>, vector<2x896xf32>
    %c0_2 = arith.constant 0 : index
    %c0_3 = arith.constant 0 : index
    %13 = vector.load %arg3[%c0_2, %c0_3] : memref<64x896xf32, #tpu.memory_space<vmem>>, vector<64x896xf32>
    %cst = arith.constant dense<0.000000e+00> : vector<2x64xf32>
    %14 = tpu.matmul %12, %13, %cst {dimension_numbers = #tpu.dot_dimension_numbers<[1], [1], [0], [0], [0, 0, 1, 0], [], []>} : vector<2x896xf32>, vector<64x896xf32>, vector<2x64xf32> -> vector<2x64xf32>
    %15 = math.tanh %14 : vector<2x64xf32>
    %16 = vector.extract_strided_slice %15 {offsets = [0, 0], sizes = [2, 32], strides = [1, 1]} : vector<2x64xf32> to vector<2x32xf32>
    %17 = vector.extract_strided_slice %15 {offsets = [0, 32], sizes = [2, 32], strides = [1, 1]} : vector<2x64xf32> to vector<2x32xf32>
    %18 = arith.addf %16, %17 : vector<2x32xf32>
    %cst_4 = arith.constant 5.000000e-01 : f32
    %19 = vector.broadcast %cst_4 : f32 to vector<2x32xf32>
    %20 = arith.mulf %19, %18 : vector<2x32xf32>
    %cst_5 = arith.constant 0.000000e+00 : f32
    %21 = vector.broadcast %cst_5 : f32 to vector<2x64xf32>
    %cst_6 = arith.constant 0.000000e+00 : f32
    %22 = vector.broadcast %cst_6 : f32 to vector<2x32xf32>
    %23 = tpu.concatenate %21, %20, %22 in 1 : vector<2x64xf32>, vector<2x32xf32>, vector<2x32xf32> -> vector<2x128xf32>
    %c1_i32 = arith.constant 1 : i32
    %24 = vector.broadcast %c1_i32 : i32 to vector<2x128xi32>
    %25 = arith.cmpi eq, %0, %24 : vector<2x128xi32>
    %26 = arith.extui %25 : vector<2x128xi1> to vector<2x128xi32>
    %27 = arith.sitofp %26 : vector<2x128xi32> to vector<2x128xf32>
    %28 = arith.addf %23, %27 : vector<2x128xf32>
    %29 = arith.addf %28, %11 : vector<2x128xf32>
    %cst_7 = arith.constant 0.000000e+00 : f32
    %30 = vector.broadcast %cst_7 : f32 to vector<2x128xf32>
    %c0_8 = arith.constant 0 : index
    %c0_9 = arith.constant 0 : index
    %31 = vector.load %arg4[%c0_8, %c0_9] : memref<128x128xf32, #tpu.memory_space<vmem>>, vector<128x128xf32>
    %cst_10 = arith.constant dense<0.000000e+00> : vector<2x128xf32>
    %32 = tpu.matmul %29, %31, %cst_10 {dimension_numbers = #tpu.dot_dimension_numbers<[1], [0], [0], [1], [0, 0, 1, 1], [], []>} : vector<2x128xf32>, vector<128x128xf32>, vector<2x128xf32> -> vector<2x128xf32>
    %c96_i32_11 = arith.constant 96 : i32
    %33 = vector.broadcast %c96_i32_11 : i32 to vector<2x128xi32>
    %34 = arith.cmpi sge, %0, %33 : vector<2x128xi32>
    %35 = math.tanh %32 : vector<2x128xf32>
    %36 = arith.negf %32 : vector<2x128xf32>
    %37 = math.exp %36 : vector<2x128xf32>
    %cst_12 = arith.constant 1.000000e+00 : f32
    %38 = vector.broadcast %cst_12 : f32 to vector<2x128xf32>
    %39 = arith.addf %38, %37 : vector<2x128xf32>
    %40 = arith.divf %38, %39 : vector<2x128xf32>
    %41 = arith.select %34, %35, %40 : vector<2x128xi1>, vector<2x128xf32>
    %c64_i32_13 = arith.constant 64 : i32
    %42 = tpu.dynamic_rotate %41 by %c64_i32_13 dim 1 : vector<2x128xf32>, i32 -> vector<2x128xf32>
    %c32_i32 = arith.constant 32 : i32
    %43 = tpu.dynamic_rotate %41 by %c32_i32 dim 1 : vector<2x128xf32>, i32 -> vector<2x128xf32>
    %c96_i32_14 = arith.constant 96 : i32
    %44 = tpu.dynamic_rotate %41 by %c96_i32_14 dim 1 : vector<2x128xf32>, i32 -> vector<2x128xf32>
    %45 = arith.mulf %43, %30 : vector<2x128xf32>
    %46 = arith.mulf %42, %44 : vector<2x128xf32>
    %47 = arith.addf %45, %46 : vector<2x128xf32>
    %48 = math.tanh %47 : vector<2x128xf32>
    %49 = arith.mulf %41, %48 : vector<2x128xf32>
    %cst_15 = arith.constant 0.000000e+00 : f32
    %50 = vector.broadcast %cst_15 : f32 to vector<2x128xf32>
    %51 = arith.select %7, %49, %50 : vector<2x128xi1>, vector<2x128xf32>
    %52 = arith.addf %51, %11 : vector<2x128xf32>
    %c0_16 = arith.constant 0 : index
    %c0_17 = arith.constant 0 : index
    %53 = vector.load %arg5[%c0_16, %c0_17] : memref<128x64xf32, #tpu.memory_space<vmem>>, vector<128x64xf32>
    %cst_18 = arith.constant dense<0.000000e+00> : vector<2x64xf32>
    %54 = tpu.matmul %52, %53, %cst_18 {dimension_numbers = #tpu.dot_dimension_numbers<[1], [0], [0], [1], [0, 0, 1, 1], [], []>} : vector<2x128xf32>, vector<128x64xf32>, vector<2x64xf32> -> vector<2x64xf32>
    %c0_19 = arith.constant 0 : index
    %c0_20 = arith.constant 0 : index
    %55 = vector.load %arg6[%c0_19, %c0_20] : memref<2x384xf32, #tpu.memory_space<vmem>>, vector<2x64xf32>
    tpu.vector_store %arg6[%c0_19, %c0_20], %54 {strides = array<i32>} : memref<2x384xf32, #tpu.memory_space<vmem>>, vector<2x64xf32>,
    %cst_21 = arith.constant dense<0xFF800000> : vector<2xf32>
    %56 = vector.multi_reduction <maximumf>, %54, %cst_21 [1] : vector<2x64xf32> to vector<2xf32>
    %57 = vector.shape_cast %56 : vector<2xf32> to vector<2x1xf32>
    %58 = vector.broadcast %57 : vector<2x1xf32> to vector<2x64xf32>
    %59 = arith.cmpf oeq, %54, %58 : vector<2x64xf32>
    %c64_i32_22 = arith.constant 64 : i32
    %60 = vector.broadcast %c64_i32_22 : i32 to vector<2x64xi32>
    %61 = arith.select %59, %2, %60 : vector<2x64xi1>, vector<2x64xi32>
    %cst_23 = arith.constant dense<2147483647> : vector<2xi32>
    %62 = vector.multi_reduction <minsi>, %61, %cst_23 [1] : vector<2x64xi32> to vector<2xi32>
    %63 = vector.shape_cast %62 : vector<2xi32> to vector<2x1xi32>
    %64 = vector.broadcast %63 : vector<2x1xi32> to vector<2x128xi32>
    %65 = arith.cmpi eq, %0, %64 : vector<2x128xi32>
    %66 = arith.extui %65 : vector<2x128xi1> to vector<2x128xi32>
    %67 = arith.sitofp %66 : vector<2x128xi32> to vector<2x128xf32>
    %c0_i32 = arith.constant 0 : i32
    %68 = vector.broadcast %c0_i32 : i32 to vector<2x128xi32>
    %c0_i32_24 = arith.constant 0 : i32
    %69 = vector.broadcast %c0_i32_24 : i32 to vector<2x128xi32>
    %70 = arith.cmpi eq, %1, %69 : vector<2x128xi32>
    %c6 = arith.constant 6 : index
    %71 = memref.load %arg1[%c6] : memref<18xi32, #tpu.memory_space<smem>>
    %72 = vector.broadcast %71 : i32 to vector<2x128xi32>
    %73 = arith.select %70, %72, %68 : vector<2x128xi1>, vector<2x128xi32>
    %c1_i32_25 = arith.constant 1 : i32
    %74 = vector.broadcast %c1_i32_25 : i32 to vector<2x128xi32>
    %75 = arith.cmpi eq, %1, %74 : vector<2x128xi32>
    %c7 = arith.constant 7 : index
    %76 = memref.load %arg1[%c7] : memref<18xi32, #tpu.memory_space<smem>>
    %77 = vector.broadcast %76 : i32 to vector<2x128xi32>
    %78 = arith.select %75, %77, %73 : vector<2x128xi1>, vector<2x128xi32>
    %79 = arith.cmpi eq, %0, %78 : vector<2x128xi32>
    %80 = arith.extui %79 : vector<2x128xi1> to vector<2x128xi32>
    %81 = arith.sitofp %80 : vector<2x128xi32> to vector<2x128xf32>
    %c0_26 = arith.constant 0 : index
    %82 = memref.load %arg1[%c0_26] : memref<18xi32, #tpu.memory_space<smem>>
    %c1_i32_27 = arith.constant 1 : i32
    %83 = arith.cmpi eq, %82, %c1_i32_27 : i32
    %84 = arith.select %83, %81, %67 : vector<2x128xf32>
    %85 = arith.addf %52, %84 : vector<2x128xf32>
    %c0_28 = arith.constant 0 : index
    %c0_29 = arith.constant 0 : index
    %86 = vector.load %arg4[%c0_28, %c0_29] : memref<128x128xf32, #tpu.memory_space<vmem>>, vector<128x128xf32>
    %cst_30 = arith.constant dense<0.000000e+00> : vector<2x128xf32>
    %87 = tpu.matmul %85, %86, %cst_30 {dimension_numbers = #tpu.dot_dimension_numbers<[1], [0], [0], [1], [0, 0, 1, 1], [], []>} : vector<2x128xf32>, vector<128x128xf32>, vector<2x128xf32> -> vector<2x128xf32>
    %c96_i32_31 = arith.constant 96 : i32
    %88 = vector.broadcast %c96_i32_31 : i32 to vector<2x128xi32>
    %89 = arith.cmpi sge, %0, %88 : vector<2x128xi32>
    %90 = math.tanh %87 : vector<2x128xf32>
    %91 = arith.negf %87 : vector<2x128xf32>
    %92 = math.exp %91 : vector<2x128xf32>
    %cst_32 = arith.constant 1.000000e+00 : f32
    %93 = vector.broadcast %cst_32 : f32 to vector<2x128xf32>
    %94 = arith.addf %93, %92 : vector<2x128xf32>
    %95 = arith.divf %93, %94 : vector<2x128xf32>
    %96 = arith.select %89, %90, %95 : vector<2x128xi1>, vector<2x128xf32>
    %c64_i32_33 = arith.constant 64 : i32
    %97 = tpu.dynamic_rotate %96 by %c64_i32_33 dim 1 : vector<2x128xf32>, i32 -> vector<2x128xf32>
    %c32_i32_34 = arith.constant 32 : i32
    %98 = tpu.dynamic_rotate %96 by %c32_i32_34 dim 1 : vector<2x128xf32>, i32 -> vector<2x128xf32>
    %c96_i32_35 = arith.constant 96 : i32
    %99 = tpu.dynamic_rotate %96 by %c96_i32_35 dim 1 : vector<2x128xf32>, i32 -> vector<2x128xf32>
    %100 = arith.mulf %98, %47 : vector<2x128xf32>
    %101 = arith.mulf %97, %99 : vector<2x128xf32>
    %102 = arith.addf %100, %101 : vector<2x128xf32>
    %103 = math.tanh %102 : vector<2x128xf32>
    %104 = arith.mulf %96, %103 : vector<2x128xf32>
    %cst_36 = arith.constant 0.000000e+00 : f32
    %105 = vector.broadcast %cst_36 : f32 to vector<2x128xf32>
    %106 = arith.select %7, %104, %105 : vector<2x128xi1>, vector<2x128xf32>
    %107 = arith.addf %106, %11 : vector<2x128xf32>
    %c0_37 = arith.constant 0 : index
    %c0_38 = arith.constant 0 : index
    %108 = vector.load %arg5[%c0_37, %c0_38] : memref<128x64xf32, #tpu.memory_space<vmem>>, vector<128x64xf32>
    %cst_39 = arith.constant dense<0.000000e+00> : vector<2x64xf32>
    %109 = tpu.matmul %107, %108, %cst_39 {dimension_numbers = #tpu.dot_dimension_numbers<[1], [0], [0], [1], [0, 0, 1, 1], [], []>} : vector<2x128xf32>, vector<128x64xf32>, vector<2x64xf32> -> vector<2x64xf32>
    %c0_40 = arith.constant 0 : index
    %c64 = arith.constant 64 : index
    %110 = vector.load %arg6[%c0_40, %c64] : memref<2x384xf32, #tpu.memory_space<vmem>>, vector<2x64xf32>
    tpu.vector_store %arg6[%c0_40, %c64], %109 {strides = array<i32>} : memref<2x384xf32, #tpu.memory_space<vmem>>, vector<2x64xf32>,
    %cst_41 = arith.constant dense<0xFF800000> : vector<2xf32>
    %111 = vector.multi_reduction <maximumf>, %109, %cst_41 [1] : vector<2x64xf32> to vector<2xf32>
    %112 = vector.shape_cast %111 : vector<2xf32> to vector<2x1xf32>
    %113 = vector.broadcast %112 : vector<2x1xf32> to vector<2x64xf32>
    %114 = arith.cmpf oeq, %109, %113 : vector<2x64xf32>
    %c64_i32_42 = arith.constant 64 : i32
    %115 = vector.broadcast %c64_i32_42 : i32 to vector<2x64xi32>
    %116 = arith.select %114, %2, %115 : vector<2x64xi1>, vector<2x64xi32>
    %cst_43 = arith.constant dense<2147483647> : vector<2xi32>
    %117 = vector.multi_reduction <minsi>, %116, %cst_43 [1] : vector<2x64xi32> to vector<2xi32>
    %118 = vector.shape_cast %117 : vector<2xi32> to vector<2x1xi32>
    %119 = vector.broadcast %118 : vector<2x1xi32> to vector<2x128xi32>
    %120 = arith.cmpi eq, %0, %119 : vector<2x128xi32>
    %121 = arith.extui %120 : vector<2x128xi1> to vector<2x128xi32>
    %122 = arith.sitofp %121 : vector<2x128xi32> to vector<2x128xf32>
    %c0_i32_44 = arith.constant 0 : i32
    %123 = vector.broadcast %c0_i32_44 : i32 to vector<2x128xi32>
    %c0_i32_45 = arith.constant 0 : i32
    %124 = vector.broadcast %c0_i32_45 : i32 to vector<2x128xi32>
    %125 = arith.cmpi eq, %1, %124 : vector<2x128xi32>
    %c8 = arith.constant 8 : index
    %126 = memref.load %arg1[%c8] : memref<18xi32, #tpu.memory_space<smem>>
    %127 = vector.broadcast %126 : i32 to vector<2x128xi32>
    %128 = arith.select %125, %127, %123 : vector<2x128xi1>, vector<2x128xi32>
    %c1_i32_46 = arith.constant 1 : i32
    %129 = vector.broadcast %c1_i32_46 : i32 to vector<2x128xi32>
    %130 = arith.cmpi eq, %1, %129 : vector<2x128xi32>
    %c9 = arith.constant 9 : index
    %131 = memref.load %arg1[%c9] : memref<18xi32, #tpu.memory_space<smem>>
    %132 = vector.broadcast %131 : i32 to vector<2x128xi32>
    %133 = arith.select %130, %132, %128 : vector<2x128xi1>, vector<2x128xi32>
    %134 = arith.cmpi eq, %0, %133 : vector<2x128xi32>
    %135 = arith.extui %134 : vector<2x128xi1> to vector<2x128xi32>
    %136 = arith.sitofp %135 : vector<2x128xi32> to vector<2x128xf32>
    %c1 = arith.constant 1 : index
    %137 = memref.load %arg1[%c1] : memref<18xi32, #tpu.memory_space<smem>>
    %c1_i32_47 = arith.constant 1 : i32
    %138 = arith.cmpi eq, %137, %c1_i32_47 : i32
    %139 = arith.select %138, %136, %122 : vector<2x128xf32>
    %140 = arith.addf %107, %139 : vector<2x128xf32>
    %c0_48 = arith.constant 0 : index
    %c0_49 = arith.constant 0 : index
    %141 = vector.load %arg4[%c0_48, %c0_49] : memref<128x128xf32, #tpu.memory_space<vmem>>, vector<128x128xf32>
    %cst_50 = arith.constant dense<0.000000e+00> : vector<2x128xf32>
    %142 = tpu.matmul %140, %141, %cst_50 {dimension_numbers = #tpu.dot_dimension_numbers<[1], [0], [0], [1], [0, 0, 1, 1], [], []>} : vector<2x128xf32>, vector<128x128xf32>, vector<2x128xf32> -> vector<2x128xf32>
    %c96_i32_51 = arith.constant 96 : i32
    %143 = vector.broadcast %c96_i32_51 : i32 to vector<2x128xi32>
    %144 = arith.cmpi sge, %0, %143 : vector<2x128xi32>
    %145 = math.tanh %142 : vector<2x128xf32>
    %146 = arith.negf %142 : vector<2x128xf32>
    %147 = math.exp %146 : vector<2x128xf32>
    %cst_52 = arith.constant 1.000000e+00 : f32
    %148 = vector.broadcast %cst_52 : f32 to vector<2x128xf32>
    %149 = arith.addf %148, %147 : vector<2x128xf32>
    %150 = arith.divf %148, %149 : vector<2x128xf32>
    %151 = arith.select %144, %145, %150 : vector<2x128xi1>, vector<2x128xf32>
    %c64_i32_53 = arith.constant 64 : i32
    %152 = tpu.dynamic_rotate %151 by %c64_i32_53 dim 1 : vector<2x128xf32>, i32 -> vector<2x128xf32>
    %c32_i32_54 = arith.constant 32 : i32
    %153 = tpu.dynamic_rotate %151 by %c32_i32_54 dim 1 : vector<2x128xf32>, i32 -> vector<2x128xf32>
    %c96_i32_55 = arith.constant 96 : i32
    %154 = tpu.dynamic_rotate %151 by %c96_i32_55 dim 1 : vector<2x128xf32>, i32 -> vector<2x128xf32>
    %155 = arith.mulf %153, %102 : vector<2x128xf32>
    %156 = arith.mulf %152, %154 : vector<2x128xf32>
    %157 = arith.addf %155, %156 : vector<2x128xf32>
    %158 = math.tanh %157 : vector<2x128xf32>
    %159 = arith.mulf %151, %158 : vector<2x128xf32>
    %cst_56 = arith.constant 0.000000e+00 : f32
    %160 = vector.broadcast %cst_56 : f32 to vector<2x128xf32>
    %161 = arith.select %7, %159, %160 : vector<2x128xi1>, vector<2x128xf32>
    %162 = arith.addf %161, %11 : vector<2x128xf32>
    %c0_57 = arith.constant 0 : index
    %c0_58 = arith.constant 0 : index
    %163 = vector.load %arg5[%c0_57, %c0_58] : memref<128x64xf32, #tpu.memory_space<vmem>>, vector<128x64xf32>
    %cst_59 = arith.constant dense<0.000000e+00> : vector<2x64xf32>
    %164 = tpu.matmul %162, %163, %cst_59 {dimension_numbers = #tpu.dot_dimension_numbers<[1], [0], [0], [1], [0, 0, 1, 1], [], []>} : vector<2x128xf32>, vector<128x64xf32>, vector<2x64xf32> -> vector<2x64xf32>
    %c0_60 = arith.constant 0 : index
    %c128 = arith.constant 128 : index
    %165 = vector.load %arg6[%c0_60, %c128] : memref<2x384xf32, #tpu.memory_space<vmem>>, vector<2x64xf32>
    tpu.vector_store %arg6[%c0_60, %c128], %164 {strides = array<i32>} : memref<2x384xf32, #tpu.memory_space<vmem>>, vector<2x64xf32>,
    %cst_61 = arith.constant dense<0xFF800000> : vector<2xf32>
    %166 = vector.multi_reduction <maximumf>, %164, %cst_61 [1] : vector<2x64xf32> to vector<2xf32>
    %167 = vector.shape_cast %166 : vector<2xf32> to vector<2x1xf32>
    %168 = vector.broadcast %167 : vector<2x1xf32> to vector<2x64xf32>
    %169 = arith.cmpf oeq, %164, %168 : vector<2x64xf32>
    %c64_i32_62 = arith.constant 64 : i32
    %170 = vector.broadcast %c64_i32_62 : i32 to vector<2x64xi32>
    %171 = arith.select %169, %2, %170 : vector<2x64xi1>, vector<2x64xi32>
    %cst_63 = arith.constant dense<2147483647> : vector<2xi32>
    %172 = vector.multi_reduction <minsi>, %171, %cst_63 [1] : vector<2x64xi32> to vector<2xi32>
    %173 = vector.shape_cast %172 : vector<2xi32> to vector<2x1xi32>
    %174 = vector.broadcast %173 : vector<2x1xi32> to vector<2x128xi32>
    %175 = arith.cmpi eq, %0, %174 : vector<2x128xi32>
    %176 = arith.extui %175 : vector<2x128xi1> to vector<2x128xi32>
    %177 = arith.sitofp %176 : vector<2x128xi32> to vector<2x128xf32>
    %c0_i32_64 = arith.constant 0 : i32
    %178 = vector.broadcast %c0_i32_64 : i32 to vector<2x128xi32>
    %c0_i32_65 = arith.constant 0 : i32
    %179 = vector.broadcast %c0_i32_65 : i32 to vector<2x128xi32>
    %180 = arith.cmpi eq, %1, %179 : vector<2x128xi32>
    %c10 = arith.constant 10 : index
    %181 = memref.load %arg1[%c10] : memref<18xi32, #tpu.memory_space<smem>>
    %182 = vector.broadcast %181 : i32 to vector<2x128xi32>
    %183 = arith.select %180, %182, %178 : vector<2x128xi1>, vector<2x128xi32>
    %c1_i32_66 = arith.constant 1 : i32
    %184 = vector.broadcast %c1_i32_66 : i32 to vector<2x128xi32>
    %185 = arith.cmpi eq, %1, %184 : vector<2x128xi32>
    %c11 = arith.constant 11 : index
    %186 = memref.load %arg1[%c11] : memref<18xi32, #tpu.memory_space<smem>>
    %187 = vector.broadcast %186 : i32 to vector<2x128xi32>
    %188 = arith.select %185, %187, %183 : vector<2x128xi1>, vector<2x128xi32>
    %189 = arith.cmpi eq, %0, %188 : vector<2x128xi32>
    %190 = arith.extui %189 : vector<2x128xi1> to vector<2x128xi32>
    %191 = arith.sitofp %190 : vector<2x128xi32> to vector<2x128xf32>
    %c2 = arith.constant 2 : index
    %192 = memref.load %arg1[%c2] : memref<18xi32, #tpu.memory_space<smem>>
    %c1_i32_67 = arith.constant 1 : i32
    %193 = arith.cmpi eq, %192, %c1_i32_67 : i32
    %194 = arith.select %193, %191, %177 : vector<2x128xf32>
    %195 = arith.addf %162, %194 : vector<2x128xf32>
    %c0_68 = arith.constant 0 : index
    %c0_69 = arith.constant 0 : index
    %196 = vector.load %arg4[%c0_68, %c0_69] : memref<128x128xf32, #tpu.memory_space<vmem>>, vector<128x128xf32>
    %cst_70 = arith.constant dense<0.000000e+00> : vector<2x128xf32>
    %197 = tpu.matmul %195, %196, %cst_70 {dimension_numbers = #tpu.dot_dimension_numbers<[1], [0], [0], [1], [0, 0, 1, 1], [], []>} : vector<2x128xf32>, vector<128x128xf32>, vector<2x128xf32> -> vector<2x128xf32>
    %c96_i32_71 = arith.constant 96 : i32
    %198 = vector.broadcast %c96_i32_71 : i32 to vector<2x128xi32>
    %199 = arith.cmpi sge, %0, %198 : vector<2x128xi32>
    %200 = math.tanh %197 : vector<2x128xf32>
    %201 = arith.negf %197 : vector<2x128xf32>
    %202 = math.exp %201 : vector<2x128xf32>
    %cst_72 = arith.constant 1.000000e+00 : f32
    %203 = vector.broadcast %cst_72 : f32 to vector<2x128xf32>
    %204 = arith.addf %203, %202 : vector<2x128xf32>
    %205 = arith.divf %203, %204 : vector<2x128xf32>
    %206 = arith.select %199, %200, %205 : vector<2x128xi1>, vector<2x128xf32>
    %c64_i32_73 = arith.constant 64 : i32
    %207 = tpu.dynamic_rotate %206 by %c64_i32_73 dim 1 : vector<2x128xf32>, i32 -> vector<2x128xf32>
    %c32_i32_74 = arith.constant 32 : i32
    %208 = tpu.dynamic_rotate %206 by %c32_i32_74 dim 1 : vector<2x128xf32>, i32 -> vector<2x128xf32>
    %c96_i32_75 = arith.constant 96 : i32
    %209 = tpu.dynamic_rotate %206 by %c96_i32_75 dim 1 : vector<2x128xf32>, i32 -> vector<2x128xf32>
    %210 = arith.mulf %208, %157 : vector<2x128xf32>
    %211 = arith.mulf %207, %209 : vector<2x128xf32>
    %212 = arith.addf %210, %211 : vector<2x128xf32>
    %213 = math.tanh %212 : vector<2x128xf32>
    %214 = arith.mulf %206, %213 : vector<2x128xf32>
    %cst_76 = arith.constant 0.000000e+00 : f32
    %215 = vector.broadcast %cst_76 : f32 to vector<2x128xf32>
    %216 = arith.select %7, %214, %215 : vector<2x128xi1>, vector<2x128xf32>
    %217 = arith.addf %216, %11 : vector<2x128xf32>
    %c0_77 = arith.constant 0 : index
    %c0_78 = arith.constant 0 : index
    %218 = vector.load %arg5[%c0_77, %c0_78] : memref<128x64xf32, #tpu.memory_space<vmem>>, vector<128x64xf32>
    %cst_79 = arith.constant dense<0.000000e+00> : vector<2x64xf32>
    %219 = tpu.matmul %217, %218, %cst_79 {dimension_numbers = #tpu.dot_dimension_numbers<[1], [0], [0], [1], [0, 0, 1, 1], [], []>} : vector<2x128xf32>, vector<128x64xf32>, vector<2x64xf32> -> vector<2x64xf32>
    %c0_80 = arith.constant 0 : index
    %c192 = arith.constant 192 : index
    %220 = vector.load %arg6[%c0_80, %c192] : memref<2x384xf32, #tpu.memory_space<vmem>>, vector<2x64xf32>
    tpu.vector_store %arg6[%c0_80, %c192], %219 {strides = array<i32>} : memref<2x384xf32, #tpu.memory_space<vmem>>, vector<2x64xf32>,
    %cst_81 = arith.constant dense<0xFF800000> : vector<2xf32>
    %221 = vector.multi_reduction <maximumf>, %219, %cst_81 [1] : vector<2x64xf32> to vector<2xf32>
    %222 = vector.shape_cast %221 : vector<2xf32> to vector<2x1xf32>
    %223 = vector.broadcast %222 : vector<2x1xf32> to vector<2x64xf32>
    %224 = arith.cmpf oeq, %219, %223 : vector<2x64xf32>
    %c64_i32_82 = arith.constant 64 : i32
    %225 = vector.broadcast %c64_i32_82 : i32 to vector<2x64xi32>
    %226 = arith.select %224, %2, %225 : vector<2x64xi1>, vector<2x64xi32>
    %cst_83 = arith.constant dense<2147483647> : vector<2xi32>
    %227 = vector.multi_reduction <minsi>, %226, %cst_83 [1] : vector<2x64xi32> to vector<2xi32>
    %228 = vector.shape_cast %227 : vector<2xi32> to vector<2x1xi32>
    %229 = vector.broadcast %228 : vector<2x1xi32> to vector<2x128xi32>
    %230 = arith.cmpi eq, %0, %229 : vector<2x128xi32>
    %231 = arith.extui %230 : vector<2x128xi1> to vector<2x128xi32>
    %232 = arith.sitofp %231 : vector<2x128xi32> to vector<2x128xf32>
    %c0_i32_84 = arith.constant 0 : i32
    %233 = vector.broadcast %c0_i32_84 : i32 to vector<2x128xi32>
    %c0_i32_85 = arith.constant 0 : i32
    %234 = vector.broadcast %c0_i32_85 : i32 to vector<2x128xi32>
    %235 = arith.cmpi eq, %1, %234 : vector<2x128xi32>
    %c12 = arith.constant 12 : index
    %236 = memref.load %arg1[%c12] : memref<18xi32, #tpu.memory_space<smem>>
    %237 = vector.broadcast %236 : i32 to vector<2x128xi32>
    %238 = arith.select %235, %237, %233 : vector<2x128xi1>, vector<2x128xi32>
    %c1_i32_86 = arith.constant 1 : i32
    %239 = vector.broadcast %c1_i32_86 : i32 to vector<2x128xi32>
    %240 = arith.cmpi eq, %1, %239 : vector<2x128xi32>
    %c13 = arith.constant 13 : index
    %241 = memref.load %arg1[%c13] : memref<18xi32, #tpu.memory_space<smem>>
    %242 = vector.broadcast %241 : i32 to vector<2x128xi32>
    %243 = arith.select %240, %242, %238 : vector<2x128xi1>, vector<2x128xi32>
    %244 = arith.cmpi eq, %0, %243 : vector<2x128xi32>
    %245 = arith.extui %244 : vector<2x128xi1> to vector<2x128xi32>
    %246 = arith.sitofp %245 : vector<2x128xi32> to vector<2x128xf32>
    %c3 = arith.constant 3 : index
    %247 = memref.load %arg1[%c3] : memref<18xi32, #tpu.memory_space<smem>>
    %c1_i32_87 = arith.constant 1 : i32
    %248 = arith.cmpi eq, %247, %c1_i32_87 : i32
    %249 = arith.select %248, %246, %232 : vector<2x128xf32>
    %250 = arith.addf %217, %249 : vector<2x128xf32>
    %c0_88 = arith.constant 0 : index
    %c0_89 = arith.constant 0 : index
    %251 = vector.load %arg4[%c0_88, %c0_89] : memref<128x128xf32, #tpu.memory_space<vmem>>, vector<128x128xf32>
    %cst_90 = arith.constant dense<0.000000e+00> : vector<2x128xf32>
    %252 = tpu.matmul %250, %251, %cst_90 {dimension_numbers = #tpu.dot_dimension_numbers<[1], [0], [0], [1], [0, 0, 1, 1], [], []>} : vector<2x128xf32>, vector<128x128xf32>, vector<2x128xf32> -> vector<2x128xf32>
    %c96_i32_91 = arith.constant 96 : i32
    %253 = vector.broadcast %c96_i32_91 : i32 to vector<2x128xi32>
    %254 = arith.cmpi sge, %0, %253 : vector<2x128xi32>
    %255 = math.tanh %252 : vector<2x128xf32>
    %256 = arith.negf %252 : vector<2x128xf32>
    %257 = math.exp %256 : vector<2x128xf32>
    %cst_92 = arith.constant 1.000000e+00 : f32
    %258 = vector.broadcast %cst_92 : f32 to vector<2x128xf32>
    %259 = arith.addf %258, %257 : vector<2x128xf32>
    %260 = arith.divf %258, %259 : vector<2x128xf32>
    %261 = arith.select %254, %255, %260 : vector<2x128xi1>, vector<2x128xf32>
    %c64_i32_93 = arith.constant 64 : i32
    %262 = tpu.dynamic_rotate %261 by %c64_i32_93 dim 1 : vector<2x128xf32>, i32 -> vector<2x128xf32>
    %c32_i32_94 = arith.constant 32 : i32
    %263 = tpu.dynamic_rotate %261 by %c32_i32_94 dim 1 : vector<2x128xf32>, i32 -> vector<2x128xf32>
    %c96_i32_95 = arith.constant 96 : i32
    %264 = tpu.dynamic_rotate %261 by %c96_i32_95 dim 1 : vector<2x128xf32>, i32 -> vector<2x128xf32>
    %265 = arith.mulf %263, %212 : vector<2x128xf32>
    %266 = arith.mulf %262, %264 : vector<2x128xf32>
    %267 = arith.addf %265, %266 : vector<2x128xf32>
    %268 = math.tanh %267 : vector<2x128xf32>
    %269 = arith.mulf %261, %268 : vector<2x128xf32>
    %cst_96 = arith.constant 0.000000e+00 : f32
    %270 = vector.broadcast %cst_96 : f32 to vector<2x128xf32>
    %271 = arith.select %7, %269, %270 : vector<2x128xi1>, vector<2x128xf32>
    %272 = arith.addf %271, %11 : vector<2x128xf32>
    %c0_97 = arith.constant 0 : index
    %c0_98 = arith.constant 0 : index
    %273 = vector.load %arg5[%c0_97, %c0_98] : memref<128x64xf32, #tpu.memory_space<vmem>>, vector<128x64xf32>
    %cst_99 = arith.constant dense<0.000000e+00> : vector<2x64xf32>
    %274 = tpu.matmul %272, %273, %cst_99 {dimension_numbers = #tpu.dot_dimension_numbers<[1], [0], [0], [1], [0, 0, 1, 1], [], []>} : vector<2x128xf32>, vector<128x64xf32>, vector<2x64xf32> -> vector<2x64xf32>
    %c0_100 = arith.constant 0 : index
    %c256 = arith.constant 256 : index
    %275 = vector.load %arg6[%c0_100, %c256] : memref<2x384xf32, #tpu.memory_space<vmem>>, vector<2x64xf32>
    tpu.vector_store %arg6[%c0_100, %c256], %274 {strides = array<i32>} : memref<2x384xf32, #tpu.memory_space<vmem>>, vector<2x64xf32>,
    %cst_101 = arith.constant dense<0xFF800000> : vector<2xf32>
    %276 = vector.multi_reduction <maximumf>, %274, %cst_101 [1] : vector<2x64xf32> to vector<2xf32>
    %277 = vector.shape_cast %276 : vector<2xf32> to vector<2x1xf32>
    %278 = vector.broadcast %277 : vector<2x1xf32> to vector<2x64xf32>
    %279 = arith.cmpf oeq, %274, %278 : vector<2x64xf32>
    %c64_i32_102 = arith.constant 64 : i32
    %280 = vector.broadcast %c64_i32_102 : i32 to vector<2x64xi32>
    %281 = arith.select %279, %2, %280 : vector<2x64xi1>, vector<2x64xi32>
    %cst_103 = arith.constant dense<2147483647> : vector<2xi32>
    %282 = vector.multi_reduction <minsi>, %281, %cst_103 [1] : vector<2x64xi32> to vector<2xi32>
    %283 = vector.shape_cast %282 : vector<2xi32> to vector<2x1xi32>
    %284 = vector.broadcast %283 : vector<2x1xi32> to vector<2x128xi32>
    %285 = arith.cmpi eq, %0, %284 : vector<2x128xi32>
    %286 = arith.extui %285 : vector<2x128xi1> to vector<2x128xi32>
    %287 = arith.sitofp %286 : vector<2x128xi32> to vector<2x128xf32>
    %c0_i32_104 = arith.constant 0 : i32
    %288 = vector.broadcast %c0_i32_104 : i32 to vector<2x128xi32>
    %c0_i32_105 = arith.constant 0 : i32
    %289 = vector.broadcast %c0_i32_105 : i32 to vector<2x128xi32>
    %290 = arith.cmpi eq, %1, %289 : vector<2x128xi32>
    %c14 = arith.constant 14 : index
    %291 = memref.load %arg1[%c14] : memref<18xi32, #tpu.memory_space<smem>>
    %292 = vector.broadcast %291 : i32 to vector<2x128xi32>
    %293 = arith.select %290, %292, %288 : vector<2x128xi1>, vector<2x128xi32>
    %c1_i32_106 = arith.constant 1 : i32
    %294 = vector.broadcast %c1_i32_106 : i32 to vector<2x128xi32>
    %295 = arith.cmpi eq, %1, %294 : vector<2x128xi32>
    %c15 = arith.constant 15 : index
    %296 = memref.load %arg1[%c15] : memref<18xi32, #tpu.memory_space<smem>>
    %297 = vector.broadcast %296 : i32 to vector<2x128xi32>
    %298 = arith.select %295, %297, %293 : vector<2x128xi1>, vector<2x128xi32>
    %299 = arith.cmpi eq, %0, %298 : vector<2x128xi32>
    %300 = arith.extui %299 : vector<2x128xi1> to vector<2x128xi32>
    %301 = arith.sitofp %300 : vector<2x128xi32> to vector<2x128xf32>
    %c4 = arith.constant 4 : index
    %302 = memref.load %arg1[%c4] : memref<18xi32, #tpu.memory_space<smem>>
    %c1_i32_107 = arith.constant 1 : i32
    %303 = arith.cmpi eq, %302, %c1_i32_107 : i32
    %304 = arith.select %303, %301, %287 : vector<2x128xf32>
    %305 = arith.addf %272, %304 : vector<2x128xf32>
    %c0_108 = arith.constant 0 : index
    %c0_109 = arith.constant 0 : index
    %306 = vector.load %arg4[%c0_108, %c0_109] : memref<128x128xf32, #tpu.memory_space<vmem>>, vector<128x128xf32>
    %cst_110 = arith.constant dense<0.000000e+00> : vector<2x128xf32>
    %307 = tpu.matmul %305, %306, %cst_110 {dimension_numbers = #tpu.dot_dimension_numbers<[1], [0], [0], [1], [0, 0, 1, 1], [], []>} : vector<2x128xf32>, vector<128x128xf32>, vector<2x128xf32> -> vector<2x128xf32>
    %c96_i32_111 = arith.constant 96 : i32
    %308 = vector.broadcast %c96_i32_111 : i32 to vector<2x128xi32>
    %309 = arith.cmpi sge, %0, %308 : vector<2x128xi32>
    %310 = math.tanh %307 : vector<2x128xf32>
    %311 = arith.negf %307 : vector<2x128xf32>
    %312 = math.exp %311 : vector<2x128xf32>
    %cst_112 = arith.constant 1.000000e+00 : f32
    %313 = vector.broadcast %cst_112 : f32 to vector<2x128xf32>
    %314 = arith.addf %313, %312 : vector<2x128xf32>
    %315 = arith.divf %313, %314 : vector<2x128xf32>
    %316 = arith.select %309, %310, %315 : vector<2x128xi1>, vector<2x128xf32>
    %c64_i32_113 = arith.constant 64 : i32
    %317 = tpu.dynamic_rotate %316 by %c64_i32_113 dim 1 : vector<2x128xf32>, i32 -> vector<2x128xf32>
    %c32_i32_114 = arith.constant 32 : i32
    %318 = tpu.dynamic_rotate %316 by %c32_i32_114 dim 1 : vector<2x128xf32>, i32 -> vector<2x128xf32>
    %c96_i32_115 = arith.constant 96 : i32
    %319 = tpu.dynamic_rotate %316 by %c96_i32_115 dim 1 : vector<2x128xf32>, i32 -> vector<2x128xf32>
    %320 = arith.mulf %318, %267 : vector<2x128xf32>
    %321 = arith.mulf %317, %319 : vector<2x128xf32>
    %322 = arith.addf %320, %321 : vector<2x128xf32>
    %323 = math.tanh %322 : vector<2x128xf32>
    %324 = arith.mulf %316, %323 : vector<2x128xf32>
    %cst_116 = arith.constant 0.000000e+00 : f32
    %325 = vector.broadcast %cst_116 : f32 to vector<2x128xf32>
    %326 = arith.select %7, %324, %325 : vector<2x128xi1>, vector<2x128xf32>
    %327 = arith.addf %326, %11 : vector<2x128xf32>
    %c0_117 = arith.constant 0 : index
    %c0_118 = arith.constant 0 : index
    %328 = vector.load %arg5[%c0_117, %c0_118] : memref<128x64xf32, #tpu.memory_space<vmem>>, vector<128x64xf32>
    %cst_119 = arith.constant dense<0.000000e+00> : vector<2x64xf32>
    %329 = tpu.matmul %327, %328, %cst_119 {dimension_numbers = #tpu.dot_dimension_numbers<[1], [0], [0], [1], [0, 0, 1, 1], [], []>} : vector<2x128xf32>, vector<128x64xf32>, vector<2x64xf32> -> vector<2x64xf32>
    %c0_120 = arith.constant 0 : index
    %c320 = arith.constant 320 : index
    %330 = vector.load %arg6[%c0_120, %c320] : memref<2x384xf32, #tpu.memory_space<vmem>>, vector<2x64xf32>
    tpu.vector_store %arg6[%c0_120, %c320], %329 {strides = array<i32>} : memref<2x384xf32, #tpu.memory_space<vmem>>, vector<2x64xf32>,
    return
  }
  func.func @transform_0(%arg0: i32, %arg1: memref<18xi32, #tpu.memory_space<smem>>) -> (i32, i32) {
    %c0_i32 = arith.constant 0 : i32
    %c0_i32_0 = arith.constant 0 : i32
    %c0_i32_1 = arith.constant 0 : i32
    return %c0_i32, %c0_i32_0 : i32, i32
  }
  func.func @transform_1(%arg0: i32, %arg1: memref<18xi32, #tpu.memory_space<smem>>) -> (i32, i32) {
    %c0_i32 = arith.constant 0 : i32
    %c0_i32_0 = arith.constant 0 : i32
    %c0_i32_1 = arith.constant 0 : i32
    return %c0_i32, %c0_i32_0 : i32, i32
  }
  func.func @transform_2(%arg0: i32, %arg1: memref<18xi32, #tpu.memory_space<smem>>) -> (i32, i32) {
    %c0_i32 = arith.constant 0 : i32
    %c0_i32_0 = arith.constant 0 : i32
    %c0_i32_1 = arith.constant 0 : i32
    return %c0_i32, %c0_i32_0 : i32, i32
  }
  func.func @transform_3(%arg0: i32, %arg1: memref<18xi32, #tpu.memory_space<smem>>) -> (i32, i32) {
    %c0_i32 = arith.constant 0 : i32
    %c0_i32_0 = arith.constant 0 : i32
    %c0_i32_1 = arith.constant 0 : i32
    return %c0_i32, %c0_i32_0 : i32, i32
  }
  func.func @transform_4(%arg0: i32, %arg1: memref<18xi32, #tpu.memory_space<smem>>) -> (i32, i32) {
    %c0_i32 = arith.constant 0 : i32
    %c0_i32_0 = arith.constant 0 : i32
    %c0_i32_1 = arith.constant 0 : i32
    return %c0_i32, %c0_i32_0 : i32, i32
  }
}

</mosaic_0001>

<bundles_post_ra>
// kernel: tpu_custom_call.1
= control target key start
LH: loop header
LB: loop body
LE: loop exit
PB: predicated region body
PF: predicated region fallthrough
CT: control target
= control target key end

     0   :  { %s3702_s0 = inlined_call_operand.vmem [shape: s32[18], index: 0, kind: input, shape index: {}]   ;;  %s3703_s1 = inlined_call_operand.vmem [shape: f32[2,896], index: 1, kind: input, shape index: {}]   ;;  %s3704_s2 = inlined_call_operand.hbm [shape: f32[64,896], index: 2, kind: input, shape index: {}]   ;;  %s3705_s3 = inlined_call_operand.vmem [shape: f32[128,128], index: 3, kind: input, shape index: {}]   ;;  %s3706_s4 = inlined_call_operand.vmem [shape: f32[128,64], index: 4, kind: input, shape index: {}]   ;;  %s3707_s5 = inlined_call_operand.hbm [shape: f32[2,384], index: 5, kind: output, shape index: {}]  }
   0x1   :  { %s10_s20 = sshll.u32 %s3702_s0, 4  ;;  %s11_s20 = int_to_ptr.vmem [resolvable:$true] %s10_s20 }
   0x2   :  { %s2963_s21 = scalar_lea.vmem %s11_s20, 16  ;;  %p2968_p1 = scmp.lt.s32.totalorder %s11_s20, %s11_s20 }
   0x3   :  { %p2964_p0 = scmp.ne.s32.totalorder %s11_s20, %s2963_s21  ;;  %p2969_p2 = scmp.lt.s32.totalorder %s2963_s21, %s2963_s21 }
   0x5   :  { %p2970_p3 = por %p2969_p2, %p2968_p1 }
   0x7   :  { %p2971_p4 = pnand %p2970_p3, %p2964_p0 }
   0x9   :  { %2974 = shalt.err (!%p2971_p4)  }
   0xa   :  { %s3025_s22 = smov [#allocation3]  }
   0xb   :  { %13 = dma.vmem_to_smem %s11_s20, 16, %s3025_s22, [#allocation2] }
   0xc   :  { %3019 = dma.done.wait [#allocation2], 16 }
   0xd   :  { %3020 = vsyncadd [#allocation2], 4294967280 }
   0xe   :  { %15 = sfence }
   0xf   :  { %16 = vsyncpa [#allocation5], 0 }
  0x10   :  { %17 = vsyncpa [#allocation6], 0  ;;  %s3026_s23 = smov [#allocation4]   ;;  %s2975_s26 = scalar_lea.hbm %s3704_s2, 7168 }
  0x11   :  { %s25_s24 = sshll.u32 %s3026_s23, 4  ;;  %p2976_p5 = scmp.ne.s32.totalorder %s3704_s2, %s2975_s26  ;;  %s26_s24 = int_to_ptr.vmem [resolvable:$true] %s25_s24 }
  0x12   :  { %p2979_p6 = scmp.lt.u32.totalorder %s2975_s26, %s3704_s2 }
  0x14   :  { %p2981_p7 = pnand %p2979_p6, %p2976_p5 }
  0x16   :  { %2984 = shalt.err (!%p2981_p7)
}
  0x17   :  { %s2985_s6 = scalar_lea.vmem %s26_s24, 7168  ;;  %p2990_p9 = scmp.lt.s32.totalorder %s26_s24, %s26_s24 }
  0x18   :  { %p2986_p8 = scmp.ne.s32.totalorder %s26_s24, %s2985_s6  ;;  %p2991_p10 = scmp.lt.s32.totalorder %s2985_s6, %s2985_s6 }
  0x1a   :  { %p2992_p11 = por %p2991_p10, %p2990_p9 }
  0x1c   :  { %p2993_p12 = pnand %p2992_p11, %p2986_p8 }
  0x1e   :  { %2996 = shalt.err (!%p2993_p12)
}
  0x1f   :  { %s3027_s7 = smov 896   ;;  %s3028_s8 = smov 56  }
  0x20   :  { %31 = dma.hbm_to_vmem [thread:$0]  %s3704_s2, 7168, %s26_s24, [#allocation5], %s3027_s7, %s3027_s7, %s3028_s8  }
  0x21   :  { %3021 = dma.done.wait [#allocation5], 7168  }
  0x22   :  { %3022 = vsyncadd [#allocation5], 4294960128  ;;  %v39_v0 = vlaneseq  ;;  %v3029_v1 = vmov 1983009808   ;;  %v3030_v3 = vmov 0.0|0.0   ;;  %vm3031_vm0 = vmmov 0  }
  0x23   :  { %v111_v2 = vunpack.c.l.s4 %v3029_v1  ;;  %2605 = vmatprep.subr.bf16.mxu1 %v3030_v3  ;;  %v3032_v4 = vmov 0.0   ;;  %v52_v7 = vld [vmem:[#allocation4 + $0x8] sm:$0xff]  ;;  %v59_v8 = vld [vmem:[#allocation4 + $0x40] sm:$0xff]  ;;  %v58_v11 = vld [vmem:[#allocation4 + $0x38] sm:$0xff]  ;;  %s3033_s28 = smov 96   ;;  %s3034_s18 = smov 64  }
  0x24   :  { %2157 = vmatprep.mubr.msk.f32.mxu1 %vm3031_vm0, %v3032_v4  ;;  %v3086_v5 = vshrl.u32 %v39_v0, 7  ;;  %v51_v9 = vld [vmem:[#allocation4] sm:$0xff]  ;;  %v2545_v10 = vpack.c.bf16 %v59_v8, %v52_v7  ;;  %v66_v12 = vld [vmem:[#allocation4 + $0x78] sm:$0xff]  ;;  %v73_v13 = vld [vmem:[#allocation4 + $0xb0] sm:$0xff]  ;;  %vm440_vm2 = vcmask 523264   ;;  %vm442_vm3 = vcmask 785408  }
  0x25   :  { %v112_v6 = vunpack.c.0.s8 %v111_v2  ;;  %v2547_v14 = vpack.c.bf16 %v58_v11, %v51_v9  ;;  %v2549_v15 = vpack.c.bf16 %v73_v13, %v66_v12  ;;  %v65_v17 = vld [vmem:[#allocation4 + $0x70] sm:$0xff]  ;;  %v72_v18 = vld [vmem:[#allocation4 + $0xa8] sm:$0xff]  ;;  %v49_v19 = vld [vmem:[%s3703_s1] sm:$0xff]  ;;  %s3035_s25 = smov 32   ;;  %vm643_vm9 = vcmask 517120   ;;  %s1865_s0 = sld [smem:[#allocation3 + $0x6]] }
  0x26   :  { %2546 = vmatprep.subr.bf16.mxu0 %v2545_v10  ;;  %v80_v20 = vld [vmem:[#allocation4 + $0xe8] sm:$0xff]  ;;  %v87_v21 = vld [vmem:[#allocation4 + $0x120] sm:$0xff]  ;;  %v2551_v23 = vpack.c.bf16 %v72_v18, %v65_v17  ;;  %v86_v27 = vld [vmem:[#allocation4 + $0x118] sm:$0xff]  ;;  %v109_v37 = vcombine.high %v49_v19, %v49_v19  ;;  %s679_s26 = sld [smem:[#allocation3]]  ;;  %s1866_s27 = sld [smem:[#allocation3 + $0x7]]  ;;  %vm668_vm12 = vcmp.eq.s32.totalorder %v3086_v5, 0 }
  0x27   :  { %v3089_v16 = vsub.s32 %v112_v6, %v3086_v5  ;;  %2548 = vmatpush1.bf16.xpose.msra.mxu0 %v2547_v14  ;;  %v2553_v25 = vpack.c.bf16 %v87_v21, %v80_v20  ;;  %v79_v26 = vld [vmem:[#allocation4 + $0xe0] sm:$0xff]  ;;  %v94_v28 = vld [vmem:[#allocation4 + $0x158] sm:$0xff]  ;;  %v101_v29 = vld [vmem:[#allocation4 + $0x190] sm:$0xff]  ;;  %vm672_vm13 = vcmp.eq.s32.totalorder %v3086_v5, 1  ;;  %s1870_s30 = sld [smem:[#allocation3 + $0x8]]  ;;  %s1873_s6 = sld [smem:[#allocation3 + $0x1]] }
  0x28   :  { %2550 = vmatprep.subr.bf16.mxu0 %v2549_v15  ;;  %v2555_v30 = vpack.c.bf16 %v86_v27, %v79_v26  ;;  %v2557_v31 = vpack.c.bf16 %v101_v29, %v94_v28  ;;  %v93_v32 = vld [vmem:[#allocation4 + $0x150] sm:$0xff]  ;;  %v100_v33 = vld [vmem:[#allocation4 + $0x188] sm:$0xff]  ;;  %v54_v34 = vld [vmem:[#allocation4 + $0x18] sm:$0xff]  ;;  %s1871_s7 = sld [smem:[#allocation3 + $0x9]]  ;;  %s1876_s9 = sld [smem:[#allocation3 + $0xa]] }
  0x29   :  { %v116_v22 = vrot.slane %v49_v19, %v3089_v16  ;;  %v61_v35 = vld [vmem:[#allocation4 + $0x50] sm:$0xff]  ;;  %v2559_v36 = vpack.c.bf16 %v100_v33, %v93_v32  ;;  %v123_v39 = vrot.slane %v109_v37, %v3089_v16  ;;  %v60_v41 = vld [vmem:[#allocation4 + $0x48] sm:$0xff]  ;;  %v75_v43 = vld [vmem:[#allocation4 + $0xc0] sm:$0xff]  ;;  %s1879_s10 = sld [smem:[#allocation3 + $0x2]]  ;;  %s1877_s2 = sld [smem:[#allocation3 + $0xb]] }
  0x2a   :  { %v2561_v38 = vpack.c.bf16 %v61_v35, %v54_v34  ;;  %v53_v40 = vld [vmem:[#allocation4 + $0x10] sm:$0xff]  ;;  %v68_v42 = vld [vmem:[#allocation4 + $0x88] sm:$0xff]  ;;  %v67_v47 = vld [vmem:[#allocation4 + $0x80] sm:$0xff]  ;;  %s1882_s19 = sld [smem:[#allocation3 + $0xc]]  ;;  %s1885_s20 = sld [smem:[#allocation3 + $0x3]] }
  0x2b   :  { %v124_v24 = vcombine.high %v116_v22, %v116_v22  ;;  %v2563_v44 = vpack.c.bf16 %v60_v41, %v53_v40  ;;  %v125_v45 = vcombine.high %v123_v39, %v123_v39  ;;  %v2565_v46 = vpack.c.bf16 %v75_v43, %v68_v42  ;;  %v74_v48 = vld [vmem:[#allocation4 + $0xb8] sm:$0xff]  ;;  %v89_v50 = vld [vmem:[#allocation4 + $0x130] sm:$0xff]  ;;  %v88_v54 = vld [vmem:[#allocation4 + $0x128] sm:$0xff]  ;;  %s1883_s21 = sld [smem:[#allocation3 + $0xd]] }
  0x2c   :  { %v82_v49 = vld [vmem:[#allocation4 + $0xf8] sm:$0xff]  ;;  %v2567_v51 = vpack.c.bf16 %v74_v48, %v67_v47  ;;  %v81_v53 = vld [vmem:[#allocation4 + $0xf0] sm:$0xff]  ;;  %v96_v55 = vld [vmem:[#allocation4 + $0x168] sm:$0xff]  ;;  %p680_p13 = scmp.eq.s32.totalorder %s679_s26, 1 }
  0x2d   :  { %213 = vmatprep.mubr.f32.mxu0 %v124_v24  ;;  %v2569_v52 = vpack.c.bf16 %v89_v50, %v82_v49  ;;  %v103_v56 = vld [vmem:[#allocation4 + $0x1a0] sm:$0xff]  ;;  %v2571_v57 = vpack.c.bf16 %v88_v54, %v81_v53  ;;  %v102_v60 = vld [vmem:[#allocation4 + $0x198] sm:$0xff]  ;;  %v56_v61 = vld [vmem:[#allocation4 + $0x28] sm:$0xff]  ;;  %p925_p0 = scmp.eq.s32.totalorder %s1873_s6, 1 }
  0x2e   :  { %v2573_v58 = vpack.c.bf16 %v103_v56, %v96_v55  ;;  %v95_v59 = vld [vmem:[#allocation4 + $0x160] sm:$0xff]  ;;  %v50_v2 = vld [vmem:[%s3703_s1 + $0x8] sm:$0x3f]  ;;  %v62_v8 = vld [vmem:[#allocation4 + $0x58] sm:$0xff]  ;;  %s681_s29 = scalar_select %p680_p13, 1, 0 }
  0x2f   :  { %2552 = vmatpush1.bf16.xpose.msra.mxu0 %v2551_v23  ;;  %v63_v62 = vld [vmem:[#allocation4 + $0x60] sm:$0xff]  ;;  %v2575_v63 = vpack.c.bf16 %v102_v60, %v95_v59  ;;  %v133_v6 = vrot.slane %v50_v2, %v3089_v16  ;;  %v70_v9 = vld [vmem:[#allocation4 + $0x98] sm:$0xff]  ;;  %v77_v10 = vld [vmem:[#allocation4 + $0xd0] sm:$0xff]  ;;  %v126_v42 = vcombine.high %v50_v2, %v50_v2  ;;  %s926_s8 = scalar_select %p925_p0, 1, 0 }
  0x30   :  { %2554 = vmatprep.subr.bf16.mxu0 %v2553_v25  ;;  %v2577_v1 = vpack.c.bf16 %v63_v62, %v56_v61  ;;  %v55_v7 = vld [vmem:[#allocation4 + $0x20] sm:$0xff]  ;;  %v2581_v13 = vpack.c.bf16 %v77_v10, %v70_v9  ;;  %v69_v14 = vld [vmem:[#allocation4 + $0x90] sm:$0xff]  ;;  %v76_v15 = vld [vmem:[#allocation4 + $0xc8] sm:$0xff]  ;;  %p1158_p1 = scmp.eq.s32.totalorder %s1879_s10, 1  ;;  %p1402_p2 = scmp.eq.s32.totalorder %s1885_s20, 1 }
  0x31   :  { %v2579_v11 = vpack.c.bf16 %v62_v8, %v55_v7  ;;  %v141_v12 = vcombine.high %v133_v6, %v133_v6  ;;  %v84_v17 = vld [vmem:[#allocation4 + $0x108] sm:$0xff]  ;;  %v91_v18 = vld [vmem:[#allocation4 + $0x140] sm:$0xff]  ;;  %v2583_v19 = vpack.c.bf16 %v76_v15, %v69_v14  ;;  %v98_v23 = vld [vmem:[#allocation4 + $0x178] sm:$0xff]  ;;  %v140_v43 = vrot.slane %v126_v42, %v3089_v16 }
  0x32   :  { %v2585_v20 = vpack.c.bf16 %v91_v18, %v84_v17  ;;  %v83_v21 = vld [vmem:[#allocation4 + $0x100] sm:$0xff]  ;;  %v105_v24 = vld [vmem:[#allocation4 + $0x1b0] sm:$0xff]  ;;  %v104_v28 = vld [vmem:[#allocation4 + $0x1a8] sm:$0xff]  ;;  %v3209_v14 = vand.u32 127, %v39_v0  ;;  %s1159_s11 = scalar_select %p1158_p1, 1, 0 }
  0x33   :  { %v2589_v26 = vpack.c.bf16 %v105_v24, %v98_v23  ;;  %v97_v27 = vld [vmem:[#allocation4 + $0x170] sm:$0xff]  ;;  %v71_v33 = vld [vmem:[#allocation4 + $0xa0] sm:$0xff]  ;;  %v78_v34 = vld [vmem:[#allocation4 + $0xd8] sm:$0xff]  ;;  %s1403_s22 = scalar_select %p1402_p2, 1, 0 }
  0x34   :  { %v2591_v29 = vpack.c.bf16 %v104_v28, %v97_v27  ;;  %v2597_v35 = vpack.c.bf16 %v78_v34, %v71_v33  ;;  %v92_v37 = vld [vmem:[#allocation4 + $0x148] sm:$0xff]  ;;  %v106_v40 = vld [vmem:[#allocation4 + $0x1b8] sm:$0xff]  ;;  %v451_v48 = vld [vmem:[%s3705_s3 + $0x10] sm:$0xff]  ;;  %vm444_vm1 = vcmp.eq.s32.totalorder %v3209_v14, 1  ;;  %vm46_vm4 = vcmp.eq.s32.totalorder %v3209_v14, 96 }
  0x35   :  { %v450_v47 = vld [vmem:[%s3705_s3 + $0x8] sm:$0xff]  ;;  %v452_v50 = vld [vmem:[%s3705_s3 + $0x18] sm:$0xff]  ;;  %v455_v56 = vld [vmem:[%s3705_s3 + $0x30] sm:$0xff]  ;;  %v1862_v15 = vsel %vm444_vm1, 1.0, %v3032_v4  ;;  %vm535_vm5 = vcmp.ge.s32.totalorder %v3209_v14, 96  ;;  %vm43_vm6 = vcmp.ge.s32.totalorder %v3209_v14, 64 }
  0x36   :  { %v454_v53 = vld [vmem:[%s3705_s3 + $0x28] sm:$0xff]  ;;  %v457_v59 = vld [vmem:[%s3705_s3 + $0x40] sm:$0xff]  ;;  %v459_v62 = vld [vmem:[%s3705_s3 + $0x50] sm:$0xff]  ;;  %vm44_vm7 = vcmp.lt.s32.totalorder %v3209_v14, 96 }
  0x37   :  { %2556 = vmatpush1.bf16.xpose.msra.mxu0 %v2555_v30  ;;  %v57_v30 = vld [vmem:[#allocation4 + $0x30] sm:$0xff]  ;;  %v458_v60 = vld [vmem:[%s3705_s3 + $0x48] sm:$0xff]  ;;  %v461_v2 = vld [vmem:[%s3705_s3 + $0x60] sm:$0xff] }
  0x38   :  { %2558 = vmatprep.subr.bf16.mxu0 %v2557_v31  ;;  %v64_v31 = vld [vmem:[#allocation4 + $0x68] sm:$0xff]  ;;  %v3162_v61 = vpack.c.bf16 %v458_v60, %v457_v59  ;;  %v463_v8 = vld [vmem:[%s3705_s3 + $0x70] sm:$0xff]  ;;  %v464_v9 = vld [vmem:[%s3705_s3 + $0x78] sm:$0xff] }
  0x39   :  { %v2594_v32 = vpack.c.bf16 %v64_v31, %v57_v30  ;;  %v3201_v10 = vpack.c.bf16 %v464_v9, %v463_v8  ;;  %v557_v0 = vld [vmem:[%s3706_s4] sm:$0xff]  ;;  %v558_v23 = vld [vmem:[%s3706_s4 + $0x8] sm:$0xff]  ;;  %v559_v24 = vld [vmem:[%s3706_s4 + $0x10] sm:$0xff] }
  0x3a   :  { %v562_v33 = vld [vmem:[%s3706_s4 + $0x28] sm:$0xff]  ;;  %v567_v42 = vld [vmem:[%s3706_s4 + $0x50] sm:$0xff]  ;;  %vm3311_vm8 = vmand %vm43_vm6, %vm44_vm7 }
  0x3f   :  { %2560 = vmatpush1.bf16.xpose.msra.mxu0 %v2559_v36  ;;  %v85_v36 = vld [vmem:[#allocation4 + $0x110] sm:$0xff] }
  0x40   :  { %2562 = vmatprep.subr.bf16.mxu0 %v2561_v38  ;;  %v2600_v38 = vpack.c.bf16 %v92_v37, %v85_v36  ;;  %v563_v36 = vld [vmem:[%s3706_s4 + $0x30] sm:$0xff]  ;;  %v564_v37 = vld [vmem:[%s3706_s4 + $0x38] sm:$0xff] }
  0x46   :  { %214 = vmatmul.mubr.f32.vlgmr.msra.gmra.mrb[0].mxu0 %v116_v22  ;;  %v90_v22 = vld [vmem:[#allocation4 + $0x138] sm:$0xff] }
  0x47   :  { %2564 = vmatpush1.bf16.xpose.msra.mxu0 %v2563_v44  ;;  %283 = vmatprep.mubr.f32.mxu0 %v125_v45  ;;  %v2587_v25 = vpack.c.bf16 %v90_v22, %v83_v21 }
  0x48   :  { %2566 = vmatprep.subr.bf16.mxu0 %v2565_v46  ;;  %v449_v46 = vld [vmem:[%s3705_s3] sm:$0xff] }
  0x49   :  { %v3119_v49 = vpack.c.bf16 %v450_v47, %v449_v46  ;;  %v569_v47 = vld [vmem:[%s3706_s4 + $0x60] sm:$0xff] }
  0x4b   :  { %2607 = vmatpush3.bf16.msra.mxu1 %v3119_v49 }
  0x4c   :  { %2608 = vmatprep.subr.bf16.mxu1 %v3030_v3 }
  0x4f   :  { %2568 = vmatpush1.bf16.xpose.msra.mxu0 %v2567_v51  ;;  %v3125_v51 = vpack.c.bf16 %v452_v50, %v451_v48  ;;  %v570_v48 = vld [vmem:[%s3706_s4 + $0x68] sm:$0xff] }
  0x50   :  { %2570 = vmatprep.subr.bf16.mxu0 %v2569_v52  ;;  %v453_v52 = vld [vmem:[%s3705_s3 + $0x20] sm:$0xff] }
  0x51   :  { %2610 = vmatpush3.bf16.msra.mxu1 %v3125_v51  ;;  %v3137_v54 = vpack.c.bf16 %v454_v53, %v453_v52  ;;  %v3290_v52 = vpack.c.bf16 %v570_v48, %v569_v47  ;;  %v571_v53 = vld [vmem:[%s3706_s4 + $0x70] sm:$0xff] }
  0x52   :  { %2611 = vmatprep.subr.bf16.mxu1 %v3030_v3 }
  0x55   :  { %2613 = vmatpush3.bf16.msra.mxu1 %v3137_v54 }
  0x56   :  { %2614 = vmatprep.subr.bf16.mxu1 %v3030_v3 }
  0x57   :  { %2572 = vmatpush1.bf16.xpose.msra.mxu0 %v2571_v57  ;;  %v456_v57 = vld [vmem:[%s3705_s3 + $0x38] sm:$0xff] }
  0x58   :  { %2574 = vmatprep.subr.bf16.mxu0 %v2573_v58  ;;  %v3150_v58 = vpack.c.bf16 %v456_v57, %v455_v56 }
  0x5a   :  { %2616 = vmatpush3.bf16.msra.mxu1 %v3150_v58 }
  0x5b   :  { %2617 = vmatprep.subr.bf16.mxu1 %v3030_v3 }
  0x5e   :  { %2619 = vmatpush3.bf16.msra.mxu1 %v3162_v61 }
  0x5f   :  { %2576 = vmatpush1.bf16.xpose.msra.mxu0 %v2575_v63  ;;  %v460_v63 = vld [vmem:[%s3705_s3 + $0x58] sm:$0xff]  ;;  %2620 = vmatprep.subr.bf16.mxu1 %v3030_v3 }
  0x60   :  { %2578 = vmatprep.subr.bf16.mxu0 %v2577_v1  ;;  %v3174_v1 = vpack.c.bf16 %v460_v63, %v459_v62 }
  0x62   :  { %2622 = vmatpush3.bf16.msra.mxu1 %v3174_v1 }
  0x63   :  { %2623 = vmatprep.subr.bf16.mxu1 %v3030_v3 }
  0x66   :  { %284 = vmatmul.mubr.f32.vlgmr.msra.gmra.mrb[0].mxu0 %v123_v39  ;;  %v99_v39 = vld [vmem:[#allocation4 + $0x180] sm:$0xff] }
  0x67   :  { %2580 = vmatpush1.bf16.xpose.msra.mxu0 %v2579_v11  ;;  %353 = vmatprep.mubr.f32.mxu0 %v141_v12  ;;  %v2603_v41 = vpack.c.bf16 %v106_v40, %v99_v39  ;;  %v565_v39 = vld [vmem:[%s3706_s4 + $0x40] sm:$0xff]  ;;  %v566_v40 = vld [vmem:[%s3706_s4 + $0x48] sm:$0xff] }
  0x68   :  { %2582 = vmatprep.subr.bf16.mxu0 %v2581_v13 }
  0x6f   :  { %2584 = vmatpush1.bf16.xpose.msra.mxu0 %v2583_v19 }
  0x70   :  { %2586 = vmatprep.subr.bf16.mxu0 %v2585_v20  ;;  %v3215_v20 = vsel %vm46_vm4, 1.0, %v3032_v4 }
  0x77   :  { %2588 = vmatpush1.bf16.xpose.msra.mxu0 %v2587_v25  ;;  %v3229_v25 = vpack.c.bf16 %v558_v23, %v557_v0 }
  0x78   :  { %2590 = vmatprep.subr.bf16.mxu0 %v2589_v26  ;;  %v560_v26 = vld [vmem:[%s3706_s4 + $0x18] sm:$0xff] }
  0x79   :  { %v3235_v27 = vpack.c.bf16 %v560_v26, %v559_v24 }
  0x7f   :  { %2592 = vmatpush1.bf16.xpose.msra.mxu0 %v2591_v29 }
  0x80   :  { %2593 = vmatprep.subr.bf16.mxu0 %v3030_v3 }
  0x86   :  { %354 = vmatmul.mubr.f32.vlgmr.msra.gmra.mrb[0].mxu0 %v133_v6  ;;  %v462_v6 = vld [vmem:[%s3705_s3 + $0x68] sm:$0xff] }
  0x87   :  { %2595 = vmatpush3.bf16.xpose.msra.mxu0 %v2594_v32  ;;  %2122 = vmatprep.mubr.msk.f32.mxu0 %vm3031_vm0, %v3032_v4  ;;  %v3186_v7 = vpack.c.bf16 %v462_v6, %v461_v2  ;;  %v561_v32 = vld [vmem:[%s3706_s4 + $0x20] sm:$0xff] }
  0x88   :  { %2596 = vmatprep.subr.bf16.mxu0 %v3030_v3 }
  0x89   :  { %2625 = vmatpush3.bf16.msra.mxu1 %v3186_v7 }
  0x8a   :  { %2626 = vmatprep.subr.bf16.mxu1 %v3030_v3 }
  0x8d   :  { %2628 = vmatpush3.bf16.msra.mxu1 %v3201_v10 }
  0x8e   :  { %2629 = vmatprep.subr.bf16.mxu1 %v3030_v3 }
  0x8f   :  { %2598 = vmatpush3.bf16.xpose.msra.mxu0 %v2597_v35  ;;  %v3246_v35 = vpack.c.bf16 %v562_v33, %v561_v32 }
  0x90   :  { %2599 = vmatprep.subr.bf16.mxu0 %v3030_v3 }
  0x97   :  { %2601 = vmatpush3.bf16.xpose.msra.mxu0 %v2600_v38  ;;  %v3256_v38 = vpack.c.bf16 %v564_v37, %v563_v36  ;;  %v682_v37 = vstv %s681_s29  ;;  %s1891_s29 = sld [smem:[#allocation3 + $0x4]] }
  0x98   :  { %2602 = vmatprep.subr.bf16.mxu0 %v3030_v3  ;;  %vm683_vm15 = vcmp.eq.s32.totalorder %v682_v37, 1 }
  0x9d   :  { %p1635_p3 = scmp.eq.s32.totalorder %s1891_s29, 1 }
  0x9f   :  { %2604 = vmatpush3.bf16.xpose.msra.mxu0 %v2603_v41  ;;  %v3266_v41 = vpack.c.bf16 %v566_v40, %v565_v39  ;;  %s1636_s6 = scalar_select %p1635_p3, 1, 0 }
  0xa0   :  { %2701 = vmatprep.subr.bf16.mxu0 %v3030_v3 }
  0xa6   :  { %2123 = vmatmul.mubr.f32.vlgmr.msra.gmra.mrb[0].mxu0 %v140_v43  ;;  %v568_v43 = vld [vmem:[%s3706_s4 + $0x58] sm:$0xff] }
  0xa7   :  { %2297 = vmatprep.mubr.msk.f32.mxu0 %vm3031_vm0, %v3032_v4  ;;  %2703 = vmatpush3.bf16.msra.mxu0 %v3119_v49 }
  0xa8   :  { %2704 = vmatprep.subr.bf16.mxu0 %v3030_v3 }
  0xab   :  { %2706 = vmatpush3.bf16.msra.mxu0 %v3125_v51 }
  0xac   :  { %2707 = vmatprep.subr.bf16.mxu0 %v3030_v3 }
  0xaf   :  { %2709 = vmatpush3.bf16.msra.mxu0 %v3137_v54 }
  0xb0   :  { %2710 = vmatprep.subr.bf16.mxu0 %v3030_v3 }
  0xb3   :  { %2712 = vmatpush3.bf16.msra.mxu0 %v3150_v58 }
  0xb4   :  { %2713 = vmatprep.subr.bf16.mxu0 %v3030_v3 }
  0xb7   :  { %2715 = vmatpush3.bf16.msra.mxu0 %v3162_v61 }
  0xb8   :  { %2716 = vmatprep.subr.bf16.mxu0 %v3030_v3 }
  0xbb   :  { %2718 = vmatpush3.bf16.msra.mxu0 %v3174_v1 }
  0xbc   :  { %2719 = vmatprep.subr.bf16.mxu0 %v3030_v3 }
  0xbf   :  { %2721 = vmatpush3.bf16.msra.mxu0 %v3186_v7 }
  0xc0   :  { %2722 = vmatprep.subr.bf16.mxu0 %v3030_v3 }
  0xc3   :  { %2724 = vmatpush3.bf16.msra.mxu0 %v3201_v10 }
  0xc4   :  { %2749 = vmatprep.subr.bf16.mxu0 %v3030_v3 }
 0x179   :  { %v425_v44 = vpop.f32.mrb[0].mxu0 }
 0x17a   :  { %2913 = vtanh.f32 %v425_v44  ;;  %v2124_v45 = vpop.f32.mrb[1].mxu0 }
 0x17b   :  { %v3277_v45 = vpack.c.bf16 %v568_v43, %v567_v42 }
 0x184   :  { %v2914_v55 = vpop.eup %2913 }
 0x185   :  { %431 = vrot.lane.b32.xlu0 %v2914_v55, %s3033_s28 }
 0x1f7   :  { %v432_v11 = vpop.permute.xlu0 %431 }
 0x1f8   :  { %v434_v12 = vadd.f32 %v2914_v55, %v432_v11  ;;  %v572_v55 = vld [vmem:[%s3706_s4 + $0x78] sm:$0xff] }
 0x1f9   :  { %v3301_v56 = vpack.c.bf16 %v572_v55, %v571_v53 }
 0x1fa   :  { %v435_v13 = vmul.f32 0.5, %v434_v12 }
 0x1fc   :  { %437 = vrot.lane.b32.xlu0 %v435_v13, %s3034_s18 }
 0x26e   :  { %v438_v17 = vpop.permute.xlu0 %437 }
 0x26f   :  { %v441_v18 = vsel %vm440_vm2, 0.0, %v438_v17 }
 0x270   :  { %v443_v19 = vsel %vm442_vm3, %v441_v18, 0.0 }
 0x271   :  { %v447_v21 = vadd.f32 %v1862_v15, %v443_v19 }
 0x273   :  { %v448_v22 = vadd.f32 %v3215_v20, %v447_v21 }
 0x275   :  { %2158 = vmatmul.mubr.f32.vlgmr.msra.gmra.mrb[0].mxu1 %v448_v22 }
 0x276   :  { %2192 = vmatprep.mubr.msk.f32.mxu1 %vm3031_vm0, %v3032_v4  ;;  %2631 = vmatpush3.bf16.msra.mxu1 %v3229_v25 }
 0x277   :  { %2632 = vmatprep.subr.bf16.mxu1 %v3030_v3 }
 0x27a   :  { %2634 = vmatpush3.bf16.msra.mxu1 %v3235_v27 }
 0x27b   :  { %2635 = vmatprep.subr.bf16.mxu1 %v3030_v3 }
 0x27e   :  { %2637 = vmatpush3.bf16.msra.mxu1 %v3246_v35 }
 0x27f   :  { %2638 = vmatprep.subr.bf16.mxu1 %v3030_v3 }
 0x282   :  { %2640 = vmatpush3.bf16.msra.mxu1 %v3256_v38 }
 0x283   :  { %2641 = vmatprep.subr.bf16.mxu1 %v3030_v3 }
 0x286   :  { %2643 = vmatpush3.bf16.msra.mxu1 %v3266_v41 }
 0x287   :  { %2644 = vmatprep.subr.bf16.mxu1 %v3030_v3 }
 0x28a   :  { %2646 = vmatpush3.bf16.msra.mxu1 %v3277_v45 }
 0x28b   :  { %2647 = vmatprep.subr.bf16.mxu1 %v3030_v3 }
 0x28e   :  { %2649 = vmatpush3.bf16.msra.mxu1 %v3290_v52 }
 0x28f   :  { %2650 = vmatprep.subr.bf16.mxu1 %v3030_v3 }
 0x292   :  { %2652 = vmatpush3.bf16.msra.mxu1 %v3301_v56 }
 0x293   :  { %2653 = vmatprep.subr.bf16.mxu1 %v3030_v3 }
 0x348   :  { %v531_v28 = vpop.f32.mrb[0].mxu1 }
 0x349   :  { %v1863_v29 = vmul.f32 -1.442695, %v531_v28  ;;  %v2159_v30 = vpop.f32.mrb[1].mxu1 }
 0x34b   :  { %2915 = vpow2.f32 %v1863_v29  ;;  %v670_v29 = vstv %s1865_s0 }
 0x34c   :  { %2917 = vtanh.f32 %v531_v28  ;;  %v671_v30 = vsel %vm668_vm12, %v670_v29, 0 }
 0x355   :  { %v2916_v31 = vpop.eup %2915 }
 0x356   :  { %v540_v34 = vadd.f32 1.0, %v2916_v31  ;;  %v2918_v44 = vpop.eup %2917  ;;  %v674_v31 = vstv %s1866_s27 }
 0x357   :  { %v675_v33 = vsel %vm672_vm13, %v674_v31, %v671_v30 }
 0x358   :  { %2919 = vrcp.f32 %v540_v34  ;;  %vm676_vm14 = vcmp.eq.s32.totalorder %v3209_v14, %v675_v33 }
 0x359   :  { %v1867_v42 = vsel %vm676_vm14, 1.0, %v3032_v4 }
 0x362   :  { %v2920_v46 = vpop.eup %2919 }
 0x363   :  { %v543_v50 = vsel %vm535_vm5, %v2918_v44, %v2920_v46 }
 0x364   :  { %548 = vrot.lane.b32.xlu0 %v543_v50, %s3033_s28  ;;  %544 = vrot.lane.b32.xlu1 %v543_v50, %s3034_s18 }
 0x368   :  { %546 = vrot.lane.b32.xlu1 %v543_v50, %s3035_s25 }
 0x3d6   :  { %v545_v57 = vpop.permute.xlu1 %544  ;;  %v549_v59 = vpop.permute.xlu0 %548 }
 0x3d7   :  { %v551_v62 = vmul.f32 %v549_v59, %v545_v57 }
 0x3da   :  { %v547_v60 = vpop.permute.xlu1 %546 }
 0x3db   :  { %v550_v63 = vmul.f32 0.0, %v547_v60 }
 0x3dd   :  { %v3306_v2 = vadd.f32 %v551_v62, %v550_v63 }
 0x3df   :  { %2921 = vtanh.f32 %v3306_v2 }
 0x3e9   :  { %v2922_v6 = vpop.eup %2921 }
 0x3ea   :  { %v554_v9 = vmul.f32 %v2922_v6, %v543_v50 }
 0x3ec   :  { %v555_v11 = vsel %vm3311_vm8, %v554_v9, 0.0 }
 0x3ed   :  { %v556_v12 = vadd.f32 %v3215_v20, %v555_v11 }
 0x3ef   :  { %2193 = vmatmul.mubr.f32.vlgmr.msra.gmra.mrb[2].mxu1 %v556_v12 }
 0x3f0   :  { %2655 = vmatpush3.bf16.msra.mxu1 %v3119_v49  ;;  %2227 = vmatprep.mubr.msk.f32.mxu1 %vm3031_vm0, %v3032_v4 }
 0x3f1   :  { %2656 = vmatprep.subr.bf16.mxu1 %v3030_v3 }
 0x3f4   :  { %2658 = vmatpush3.bf16.msra.mxu1 %v3125_v51 }
 0x3f5   :  { %2659 = vmatprep.subr.bf16.mxu1 %v3030_v3 }
 0x3f8   :  { %2661 = vmatpush3.bf16.msra.mxu1 %v3137_v54 }
 0x3f9   :  { %2662 = vmatprep.subr.bf16.mxu1 %v3030_v3 }
 0x3fc   :  { %2664 = vmatpush3.bf16.msra.mxu1 %v3150_v58 }
 0x3fd   :  { %2665 = vmatprep.subr.bf16.mxu1 %v3030_v3 }
 0x400   :  { %2667 = vmatpush3.bf16.msra.mxu1 %v3162_v61 }
 0x401   :  { %2668 = vmatprep.subr.bf16.mxu1 %v3030_v3 }
 0x404   :  { %2670 = vmatpush3.bf16.msra.mxu1 %v3174_v1 }
 0x405   :  { %2671 = vmatprep.subr.bf16.mxu1 %v3030_v3 }
 0x408   :  { %2673 = vmatpush3.bf16.msra.mxu1 %v3186_v7 }
 0x409   :  { %2674 = vmatprep.subr.bf16.mxu1 %v3030_v3 }
 0x40c   :  { %2676 = vmatpush3.bf16.msra.mxu1 %v3201_v10 }
 0x40d   :  { %2677 = vmatprep.subr.bf16.mxu1 %v3030_v3 }
 0x4c2   :  { %v639_v13 = vpop.f32.mrb[2].mxu1 }
 0x4c3   :  { %644 = vst.msk [vmem:[#allocation7] sm:$0x3] %vm643_vm9, %v639_v13  ;;  %v2194_v15 = vpop.f32.mrb[3].mxu1  ;;  %v645_v17 = vsel %vm643_vm9, %v639_v13, -inf }
 0x4c4   :  { %646 = vmax.xlane.f32.xlu1 %v645_v17 }
 0x551   :  { %v647_v18 = vpop.xlane.xlu1 %646 }
 0x552   :  { %vm648_vm10 = vcmp.eq.f32.partialorder %v639_v13, %v647_v18 }
 0x553   :  { %v649_v19 = vsel %vm648_vm10, %v3209_v14, 64 }
 0x554   :  { %v650_v21 = vsel %vm643_vm9, %v649_v19, 2147483647 }
 0x555   :  { %v652_v22 = vshra.s32 %v650_v21, 16  ;;  %v651_v23 = vand.u32 65535, %v650_v21 }
 0x557   :  { %v654_v0 = vcvt.s32.f32 %v652_v22  ;;  %v653_v26 = vcvt.s32.f32 %v651_v23 }
 0x559   :  { %655 = vmin.xlane.f32.xlu0 %v654_v0 }
 0x5e6   :  { %v656_v24 = vpop.xlane.xlu0 %655 }
 0x5e7   :  { %vm657_vm11 = vcmp.eq.f32.partialorder %v654_v0, %v656_v24  ;;  %v662_v32 = vcvt.f32.s32 %v656_v24 }
 0x5e8   :  { %v658_v28 = vsel %vm657_vm11, %v653_v26, inf }
 0x5e9   :  { %659 = vmin.xlane.f32.xlu0 %v658_v28  ;;  %v663_v36 = vshll.u32 %v662_v32, 16  ;;  %v916_v32 = vstv %s1870_s30  ;;  %s1889_s30 = sld [smem:[#allocation3 + $0xf]] }
 0x5ea   :  { %v917_v33 = vsel %vm668_vm12, %v916_v32, 0 }
 0x676   :  { %v660_v34 = vpop.xlane.xlu0 %659 }
 0x677   :  { %v661_v39 = vcvt.f32.s32 %v660_v34  ;;  %v919_v34 = vstv %s1871_s7 }
 0x678   :  { %v920_v37 = vsel %vm672_vm13, %v919_v34, %v917_v33 }
 0x679   :  { %v664_v40 = vadd.s32 %v663_v36, %v661_v39  ;;  %vm921_vm4 = vcmp.eq.s32.totalorder %v3209_v14, %v920_v37 }
 0x67b   :  { %vm665_vm1 = vcmp.eq.s32.totalorder %v3209_v14, %v664_v40 }
 0x67c   :  { %v1864_v43 = vsel %vm665_vm1, 1.0, %v3032_v4 }
 0x67d   :  { %v684_v44 = vsel %vm683_vm15, %v1867_v42, %v1864_v43  ;;  %v927_v42 = vstv %s926_s8 }
 0x67e   :  { %v685_v46 = vadd.f32 %v684_v44, %v556_v12  ;;  %vm928_vm6 = vcmp.eq.s32.totalorder %v927_v42, 1 }
 0x680   :  { %2228 = vmatmul.mubr.f32.vlgmr.msra.gmra.mrb[4].mxu1 %v685_v46  ;;  %v1872_v46 = vsel %vm921_vm4, 1.0, %v3032_v4 }
 0x681   :  { %2679 = vmatpush3.bf16.msra.mxu1 %v3229_v25  ;;  %2262 = vmatprep.mubr.msk.f32.mxu1 %vm3031_vm0, %v3032_v4 }
 0x682   :  { %2680 = vmatprep.subr.bf16.mxu1 %v3030_v3 }
 0x685   :  { %2682 = vmatpush3.bf16.msra.mxu1 %v3235_v27 }
 0x686   :  { %2683 = vmatprep.subr.bf16.mxu1 %v3030_v3 }
 0x689   :  { %2685 = vmatpush3.bf16.msra.mxu1 %v3246_v35 }
 0x68a   :  { %2686 = vmatprep.subr.bf16.mxu1 %v3030_v3 }
 0x68d   :  { %2688 = vmatpush3.bf16.msra.mxu1 %v3256_v38 }
 0x68e   :  { %2689 = vmatprep.subr.bf16.mxu1 %v3030_v3 }
 0x691   :  { %2691 = vmatpush3.bf16.msra.mxu1 %v3266_v41 }
 0x692   :  { %2692 = vmatprep.subr.bf16.mxu1 %v3030_v3 }
 0x695   :  { %2694 = vmatpush3.bf16.msra.mxu1 %v3277_v45 }
 0x696   :  { %2695 = vmatprep.subr.bf16.mxu1 %v3030_v3 }
 0x699   :  { %2697 = vmatpush3.bf16.msra.mxu1 %v3290_v52 }
 0x69a   :  { %2698 = vmatprep.subr.bf16.mxu1 %v3030_v3 }
 0x69d   :  { %2700 = vmatpush3.bf16.msra.mxu1 %v3301_v56 }
 0x69e   :  { %2725 = vmatprep.subr.bf16.mxu1 %v3030_v3 }
 0x753   :  { %v768_v47 = vpop.f32.mrb[4].mxu1 }
 0x754   :  { %v1868_v48 = vmul.f32 -1.442695, %v768_v47  ;;  %v2229_v50 = vpop.f32.mrb[5].mxu1 }
 0x756   :  { %2923 = vpow2.f32 %v1868_v48 }
 0x757   :  { %2925 = vtanh.f32 %v768_v47 }
 0x760   :  { %v2924_v53 = vpop.eup %2923 }
 0x761   :  { %v776_v55 = vadd.f32 1.0, %v2924_v53  ;;  %v2926_v57 = vpop.eup %2925 }
 0x763   :  { %2927 = vrcp.f32 %v776_v55 }
 0x76d   :  { %v2928_v59 = vpop.eup %2927 }
 0x76e   :  { %v779_v60 = vsel %vm535_vm5, %v2926_v57, %v2928_v59 }
 0x76f   :  { %782 = vrot.lane.b32.xlu0 %v779_v60, %s3035_s25  ;;  %780 = vrot.lane.b32.xlu1 %v779_v60, %s3034_s18 }
 0x773   :  { %784 = vrot.lane.b32.xlu1 %v779_v60, %s3033_s28 }
 0x7e1   :  { %v781_v62 = vpop.permute.xlu1 %780  ;;  %v783_v63 = vpop.permute.xlu0 %782 }
 0x7e2   :  { %v786_v9 = vmul.f32 %v783_v63, %v3306_v2 }
 0x7e5   :  { %v785_v6 = vpop.permute.xlu1 %784 }
 0x7e6   :  { %v787_v11 = vmul.f32 %v785_v6, %v781_v62 }
 0x7e8   :  { %v3374_v12 = vadd.f32 %v787_v11, %v786_v9 }
 0x7ea   :  { %2929 = vtanh.f32 %v3374_v12 }
 0x7f4   :  { %v2930_v13 = vpop.eup %2929 }
 0x7f5   :  { %v790_v15 = vmul.f32 %v2930_v13, %v779_v60 }
 0x7f7   :  { %v791_v17 = vsel %vm3311_vm8, %v790_v15, 0.0 }
 0x7f8   :  { %v792_v18 = vadd.f32 %v3215_v20, %v791_v17 }
 0x7fa   :  { %2263 = vmatmul.mubr.f32.vlgmr.msra.gmra.mrb[6].mxu1 %v792_v18 }
 0x7fb   :  { %2727 = vmatpush3.bf16.msra.mxu1 %v3229_v25  ;;  %2332 = vmatprep.mubr.msk.f32.mxu1 %vm3031_vm0, %v3032_v4 }
 0x7fc   :  { %2728 = vmatprep.subr.bf16.mxu1 %v3030_v3 }
 0x7ff   :  { %2730 = vmatpush3.bf16.msra.mxu1 %v3235_v27 }
 0x800   :  { %2731 = vmatprep.subr.bf16.mxu1 %v3030_v3 }
 0x803   :  { %2733 = vmatpush3.bf16.msra.mxu1 %v3246_v35 }
 0x804   :  { %2734 = vmatprep.subr.bf16.mxu1 %v3030_v3 }
 0x807   :  { %2736 = vmatpush3.bf16.msra.mxu1 %v3256_v38 }
 0x808   :  { %2737 = vmatprep.subr.bf16.mxu1 %v3030_v3 }
 0x80b   :  { %2739 = vmatpush3.bf16.msra.mxu1 %v3266_v41 }
 0x80c   :  { %2740 = vmatprep.subr.bf16.mxu1 %v3030_v3 }
 0x80f   :  { %2742 = vmatpush3.bf16.msra.mxu1 %v3277_v45 }
 0x810   :  { %2743 = vmatprep.subr.bf16.mxu1 %v3030_v3 }
 0x813   :  { %2745 = vmatpush3.bf16.msra.mxu1 %v3290_v52 }
 0x814   :  { %2746 = vmatprep.subr.bf16.mxu1 %v3030_v3 }
 0x817   :  { %2748 = vmatpush3.bf16.msra.mxu1 %v3301_v56 }
 0x818   :  { %2773 = vmatprep.subr.bf16.mxu1 %v3030_v3 }
 0x8cd   :  { %v3398_v2 = vpop.f32.mrb[6].mxu1 }
 0x8ce   :  { %v2264_v19 = vpop.f32.mrb[7].mxu1  ;;  %v892_v21 = vsel %vm643_vm9, %v3398_v2, -inf }
 0x8cf   :  { %893 = vmax.xlane.f32.xlu1 %v892_v21  ;;  %v1152_v21 = vstv %s1877_s2 }
 0x95c   :  { %v894_v22 = vpop.xlane.xlu1 %893 }
 0x95d   :  { %vm895_vm2 = vcmp.eq.f32.partialorder %v3398_v2, %v894_v22 }
 0x95e   :  { %v896_v0 = vsel %vm895_vm2, %v3209_v14, 64 }
 0x95f   :  { %v897_v23 = vsel %vm643_vm9, %v896_v0, 2147483647 }
 0x960   :  { %v899_v24 = vshra.s32 %v897_v23, 16  ;;  %v898_v28 = vand.u32 65535, %v897_v23 }
 0x962   :  { %v901_v26 = vcvt.s32.f32 %v899_v24  ;;  %v900_v30 = vcvt.s32.f32 %v898_v28 }
 0x964   :  { %902 = vmin.xlane.f32.xlu0 %v901_v26 }
 0x9f1   :  { %v903_v29 = vpop.xlane.xlu0 %902 }
 0x9f2   :  { %vm904_vm3 = vcmp.eq.f32.partialorder %v901_v26, %v903_v29  ;;  %v909_v36 = vcvt.f32.s32 %v903_v29  ;;  %v1160_v26 = vstv %s1159_s11 }
 0x9f3   :  { %v905_v31 = vsel %vm904_vm3, %v900_v30, inf  ;;  %vm1161_vm15 = vcmp.eq.s32.totalorder %v1160_v26, 1  ;;  %v1421_v26 = vld [vmem:[%s3705_s3 + $0x68] sm:$0xff] }
 0x9f4   :  { %906 = vmin.xlane.f32.xlu0 %v905_v31  ;;  %v910_v40 = vshll.u32 %v909_v36, 16 }
 0xa81   :  { %v907_v39 = vpop.xlane.xlu0 %906 }
 0xa82   :  { %v908_v43 = vcvt.f32.s32 %v907_v39 }
 0xa84   :  { %v911_v44 = vadd.s32 %v910_v40, %v908_v43 }
 0xa86   :  { %vm912_vm7 = vcmp.eq.s32.totalorder %v3209_v14, %v911_v44 }
 0xa87   :  { %v1869_v47 = vsel %vm912_vm7, 1.0, %v3032_v4 }
 0xa88   :  { %v929_v48 = vsel %vm928_vm6, %v1872_v46, %v1869_v47 }
 0xa89   :  { %v930_v50 = vadd.f32 %v929_v48, %v792_v18  ;;  %v1149_v18 = vstv %s1876_s9 }
 0xa8a   :  { %v1150_v19 = vsel %vm668_vm12, %v1149_v18, 0  ;;  %v1419_v18 = vld [vmem:[%s3705_s3 + $0x58] sm:$0xff] }
 0xa8b   :  { %2298 = vmatmul.mubr.f32.vlgmr.msra.gmra.mrb[2].mxu0 %v930_v50  ;;  %v1153_v0 = vsel %vm672_vm13, %v1152_v21, %v1150_v19 }
 0xa8c   :  { %2751 = vmatpush3.bf16.msra.mxu0 %v3119_v49  ;;  %2367 = vmatprep.mubr.msk.f32.mxu0 %vm3031_vm0, %v3032_v4  ;;  %vm1154_vm14 = vcmp.eq.s32.totalorder %v3209_v14, %v1153_v0 }
 0xa8d   :  { %2752 = vmatprep.subr.bf16.mxu0 %v3030_v3  ;;  %v1878_v30 = vsel %vm1154_vm14, 1.0, %v3032_v4 }
 0xa90   :  { %2754 = vmatpush3.bf16.msra.mxu0 %v3125_v51 }
 0xa91   :  { %2755 = vmatprep.subr.bf16.mxu0 %v3030_v3 }
 0xa94   :  { %2757 = vmatpush3.bf16.msra.mxu0 %v3137_v54 }
 0xa95   :  { %2758 = vmatprep.subr.bf16.mxu0 %v3030_v3 }
 0xa98   :  { %2760 = vmatpush3.bf16.msra.mxu0 %v3150_v58 }
 0xa99   :  { %2761 = vmatprep.subr.bf16.mxu0 %v3030_v3 }
 0xa9c   :  { %2763 = vmatpush3.bf16.msra.mxu0 %v3162_v61 }
 0xa9d   :  { %2764 = vmatprep.subr.bf16.mxu0 %v3030_v3 }
 0xaa0   :  { %2766 = vmatpush3.bf16.msra.mxu0 %v3174_v1 }
 0xaa1   :  { %2767 = vmatprep.subr.bf16.mxu0 %v3030_v3 }
 0xaa4   :  { %2769 = vmatpush3.bf16.msra.mxu0 %v3186_v7 }
 0xaa5   :  { %2770 = vmatprep.subr.bf16.mxu0 %v3030_v3 }
 0xaa8   :  { %2772 = vmatpush3.bf16.msra.mxu0 %v3201_v10 }
 0xaa9   :  { %2797 = vmatprep.subr.bf16.mxu0 %v3030_v3 }
 0xb5e   :  { %v1013_v49 = vpop.f32.mrb[2].mxu0 }
 0xb5f   :  { %v1874_v51 = vmul.f32 -1.442695, %v1013_v49  ;;  %v2299_v54 = vpop.f32.mrb[3].mxu0 }
 0xb61   :  { %2931 = vpow2.f32 %v1874_v51 }
 0xb62   :  { %2933 = vtanh.f32 %v1013_v49 }
 0xb6b   :  { %v2932_v58 = vpop.eup %2931 }
 0xb6c   :  { %v1021_v61 = vadd.f32 1.0, %v2932_v58  ;;  %v2934_v53 = vpop.eup %2933 }
 0xb6e   :  { %2935 = vrcp.f32 %v1021_v61 }
 0xb78   :  { %v2936_v1 = vpop.eup %2935 }
 0xb79   :  { %v1024_v55 = vsel %vm535_vm5, %v2934_v53, %v2936_v1 }
 0xb7a   :  { %1027 = vrot.lane.b32.xlu0 %v1024_v55, %s3035_s25  ;;  %1025 = vrot.lane.b32.xlu1 %v1024_v55, %s3034_s18 }
 0xb7e   :  { %1029 = vrot.lane.b32.xlu1 %v1024_v55, %s3033_s28 }
 0xbec   :  { %v1026_v7 = vpop.permute.xlu1 %1025  ;;  %v1028_v10 = vpop.permute.xlu0 %1027 }
 0xbed   :  { %v1031_v59 = vmul.f32 %v1028_v10, %v3374_v12 }
 0xbf0   :  { %v1030_v57 = vpop.permute.xlu1 %1029 }
 0xbf1   :  { %v1032_v60 = vmul.f32 %v1030_v57, %v1026_v7 }
 0xbf3   :  { %v3437_v62 = vadd.f32 %v1032_v60, %v1031_v59 }
 0xbf5   :  { %2937 = vtanh.f32 %v3437_v62 }
 0xbff   :  { %v2938_v63 = vpop.eup %2937 }
 0xc00   :  { %v1035_v6 = vmul.f32 %v2938_v63, %v1024_v55  ;;  %v1408_v63 = vld [vmem:[%s3705_s3] sm:$0xff] }
 0xc02   :  { %v1036_v9 = vsel %vm3311_vm8, %v1035_v6, 0.0  ;;  %v1409_v6 = vld [vmem:[%s3705_s3 + $0x8] sm:$0xff] }
 0xc03   :  { %v1037_v11 = vadd.f32 %v3215_v20, %v1036_v9  ;;  %v1410_v9 = vld [vmem:[%s3705_s3 + $0x10] sm:$0xff] }
 0xc05   :  { %2333 = vmatmul.mubr.f32.vlgmr.msra.gmra.mrb[8].mxu1 %v1037_v11 }
 0xc06   :  { %2775 = vmatpush3.bf16.msra.mxu1 %v3229_v25  ;;  %2402 = vmatprep.mubr.msk.f32.mxu1 %vm3031_vm0, %v3032_v4 }
 0xc07   :  { %2776 = vmatprep.subr.bf16.mxu1 %v3030_v3 }
 0xc0a   :  { %2778 = vmatpush3.bf16.msra.mxu1 %v3235_v27 }
 0xc0b   :  { %2779 = vmatprep.subr.bf16.mxu1 %v3030_v3 }
 0xc0e   :  { %2781 = vmatpush3.bf16.msra.mxu1 %v3246_v35 }
 0xc0f   :  { %2782 = vmatprep.subr.bf16.mxu1 %v3030_v3 }
 0xc12   :  { %2784 = vmatpush3.bf16.msra.mxu1 %v3256_v38 }
 0xc13   :  { %2785 = vmatprep.subr.bf16.mxu1 %v3030_v3 }
 0xc16   :  { %2787 = vmatpush3.bf16.msra.mxu1 %v3266_v41 }
 0xc17   :  { %2788 = vmatprep.subr.bf16.mxu1 %v3030_v3 }
 0xc1a   :  { %2790 = vmatpush3.bf16.msra.mxu1 %v3277_v45 }
 0xc1b   :  { %2791 = vmatprep.subr.bf16.mxu1 %v3030_v3 }
 0xc1e   :  { %2793 = vmatpush3.bf16.msra.mxu1 %v3290_v52 }
 0xc1f   :  { %2794 = vmatprep.subr.bf16.mxu1 %v3030_v3 }
 0xc22   :  { %2796 = vmatpush3.bf16.msra.mxu1 %v3301_v56 }
 0xc23   :  { %2821 = vmatprep.subr.bf16.mxu1 %v3030_v3 }
 0xcd8   :  { %v1120_v25 = vpop.f32.mrb[8].mxu1 }
 0xcd9   :  { %1124 = vst.msk [vmem:[#allocation7 + $0x2] sm:$0x3] %vm643_vm9, %v1120_v25  ;;  %v2334_v27 = vpop.f32.mrb[9].mxu1  ;;  %v1125_v35 = vsel %vm643_vm9, %v1120_v25, -inf }
 0xcda   :  { %1126 = vmax.xlane.f32.xlu1 %v1125_v35  ;;  %v1412_v35 = vld [vmem:[%s3705_s3 + $0x20] sm:$0xff] }
 0xd67   :  { %v1127_v38 = vpop.xlane.xlu1 %1126 }
 0xd68   :  { %vm1128_vm10 = vcmp.eq.f32.partialorder %v1120_v25, %v1127_v38  ;;  %v1411_v25 = vld [vmem:[%s3705_s3 + $0x18] sm:$0xff]  ;;  %v1413_v38 = vld [vmem:[%s3705_s3 + $0x28] sm:$0xff] }
 0xd69   :  { %v1129_v41 = vsel %vm1128_vm10, %v3209_v14, 64  ;;  %v3514_v27 = vpack.c.bf16 %v1411_v25, %v1410_v9  ;;  %v1521_v9 = vld [vmem:[%s3706_s4 + $0x30] sm:$0xff] }
 0xd6a   :  { %v1130_v45 = vsel %vm643_vm9, %v1129_v41, 2147483647  ;;  %v2804_v41 = vpack.c.bf16 %v1413_v38, %v1412_v35  ;;  %v1524_v35 = vld [vmem:[%s3706_s4 + $0x48] sm:$0xff] }
 0xd6b   :  { %v1132_v52 = vshra.s32 %v1130_v45, 16  ;;  %v1131_v13 = vand.u32 65535, %v1130_v45  ;;  %v1414_v45 = vld [vmem:[%s3705_s3 + $0x30] sm:$0xff] }
 0xd6d   :  { %v1134_v12 = vcvt.s32.f32 %v1132_v52  ;;  %v1133_v15 = vcvt.s32.f32 %v1131_v13  ;;  %v1415_v52 = vld [vmem:[%s3705_s3 + $0x38] sm:$0xff]  ;;  %v1416_v13 = vld [vmem:[%s3705_s3 + $0x40] sm:$0xff] }
 0xd6f   :  { %1135 = vmin.xlane.f32.xlu0 %v1134_v12 }
 0xdfc   :  { %v1136_v56 = vpop.xlane.xlu0 %1135 }
 0xdfd   :  { %vm1137_vm11 = vcmp.eq.f32.partialorder %v1134_v12, %v1136_v56  ;;  %v1142_v22 = vcvt.f32.s32 %v1136_v56  ;;  %v2807_v12 = vpack.c.bf16 %v1415_v52, %v1414_v45  ;;  %v1417_v56 = vld [vmem:[%s3705_s3 + $0x48] sm:$0xff]  ;;  %v1526_v45 = vld [vmem:[%s3706_s4 + $0x58] sm:$0xff] }
 0xdfe   :  { %v1138_v17 = vsel %vm1137_vm11, %v1133_v15, inf  ;;  %v2810_v15 = vpack.c.bf16 %v1417_v56, %v1416_v13  ;;  %v1527_v56 = vld [vmem:[%s3706_s4 + $0x60] sm:$0xff] }
 0xdff   :  { %1139 = vmin.xlane.f32.xlu0 %v1138_v17  ;;  %v1143_v24 = vshll.u32 %v1142_v22, 16  ;;  %v1418_v17 = vld [vmem:[%s3705_s3 + $0x50] sm:$0xff] }
 0xe00   :  { %v2813_v19 = vpack.c.bf16 %v1419_v18, %v1418_v17 }
 0xe8c   :  { %v1140_v23 = vpop.xlane.xlu0 %1139 }
 0xe8d   :  { %v1141_v28 = vcvt.f32.s32 %v1140_v23 }
 0xe8f   :  { %v1144_v29 = vadd.s32 %v1143_v24, %v1141_v28  ;;  %v1420_v24 = vld [vmem:[%s3705_s3 + $0x60] sm:$0xff] }
 0xe90   :  { %v2816_v28 = vpack.c.bf16 %v1421_v26, %v1420_v24 }
 0xe91   :  { %vm1145_vm1 = vcmp.eq.s32.totalorder %v3209_v14, %v1144_v29  ;;  %v1422_v29 = vld [vmem:[%s3705_s3 + $0x70] sm:$0xff] }
 0xe92   :  { %v1875_v31 = vsel %vm1145_vm1, 1.0, %v3032_v4 }
 0xe93   :  { %v1162_v32 = vsel %vm1161_vm15, %v1878_v30, %v1875_v31  ;;  %v1423_v30 = vld [vmem:[%s3705_s3 + $0x78] sm:$0xff] }
 0xe94   :  { %v1163_v33 = vadd.f32 %v1162_v32, %v1037_v11  ;;  %v3508_v11 = vpack.c.bf16 %v1409_v6, %v1408_v63  ;;  %v2819_v31 = vpack.c.bf16 %v1423_v30, %v1422_v29  ;;  %v1393_v32 = vstv %s1882_s19 }
 0xe96   :  { %2368 = vmatmul.mubr.f32.vlgmr.msra.gmra.mrb[4].mxu0 %v1163_v33  ;;  %v1394_v33 = vsel %vm668_vm12, %v1393_v32, 0 }
 0xe97   :  { %2437 = vmatprep.mubr.msk.f32.mxu0 %vm3031_vm0, %v3032_v4  ;;  %2799 = vmatpush3.bf16.msra.mxu0 %v3508_v11 }
 0xe98   :  { %2800 = vmatprep.subr.bf16.mxu0 %v3030_v3 }
 0xe9b   :  { %2802 = vmatpush3.bf16.msra.mxu0 %v3514_v27 }
 0xe9c   :  { %2803 = vmatprep.subr.bf16.mxu0 %v3030_v3 }
 0xe9f   :  { %2805 = vmatpush3.bf16.msra.mxu0 %v2804_v41 }
 0xea0   :  { %2806 = vmatprep.subr.bf16.mxu0 %v3030_v3 }
 0xea3   :  { %2808 = vmatpush3.bf16.msra.mxu0 %v2807_v12 }
 0xea4   :  { %2809 = vmatprep.subr.bf16.mxu0 %v3030_v3 }
 0xea7   :  { %2811 = vmatpush3.bf16.msra.mxu0 %v2810_v15 }
 0xea8   :  { %2812 = vmatprep.subr.bf16.mxu0 %v3030_v3 }
 0xeab   :  { %2814 = vmatpush3.bf16.msra.mxu0 %v2813_v19 }
 0xeac   :  { %2815 = vmatprep.subr.bf16.mxu0 %v3030_v3 }
 0xeaf   :  { %2817 = vmatpush3.bf16.msra.mxu0 %v2816_v28 }
 0xeb0   :  { %2818 = vmatprep.subr.bf16.mxu0 %v3030_v3 }
 0xeb3   :  { %2820 = vmatpush3.bf16.msra.mxu0 %v2819_v31 }
 0xeb4   :  { %2845 = vmatprep.subr.bf16.mxu0 %v3030_v3 }
 0xf69   :  { %v1246_v34 = vpop.f32.mrb[4].mxu0 }
 0xf6a   :  { %v1880_v36 = vmul.f32 -1.442695, %v1246_v34  ;;  %v2369_v37 = vpop.f32.mrb[5].mxu0 }
 0xf6c   :  { %2939 = vpow2.f32 %v1880_v36 }
 0xf6d   :  { %2941 = vtanh.f32 %v1246_v34  ;;  %v1396_v34 = vstv %s1883_s21 }
 0xf6e   :  { %v1397_v37 = vsel %vm672_vm13, %v1396_v34, %v1394_v33 }
 0xf6f   :  { %vm1398_vm4 = vcmp.eq.s32.totalorder %v3209_v14, %v1397_v37 }
 0xf76   :  { %v2940_v39 = vpop.eup %2939 }
 0xf77   :  { %v1254_v40 = vadd.f32 1.0, %v2940_v39  ;;  %v2942_v42 = vpop.eup %2941 }
 0xf79   :  { %2943 = vrcp.f32 %v1254_v40 }
 0xf83   :  { %v2944_v43 = vpop.eup %2943 }
 0xf84   :  { %v1257_v44 = vsel %vm535_vm5, %v2942_v42, %v2944_v43  ;;  %v1404_v42 = vstv %s1403_s22 }
 0xf85   :  { %1260 = vrot.lane.b32.xlu0 %v1257_v44, %s3035_s25  ;;  %1258 = vrot.lane.b32.xlu1 %v1257_v44, %s3034_s18  ;;  %vm1405_vm6 = vcmp.eq.s32.totalorder %v1404_v42, 1 }
 0xf89   :  { %1262 = vrot.lane.b32.xlu1 %v1257_v44, %s3033_s28 }
 0xff7   :  { %v1259_v46 = vpop.permute.xlu1 %1258  ;;  %v1261_v47 = vpop.permute.xlu0 %1260 }
 0xff8   :  { %v1264_v50 = vmul.f32 %v1261_v47, %v3437_v62 }
 0xffb   :  { %v1263_v48 = vpop.permute.xlu1 %1262 }
 0xffc   :  { %v1265_v49 = vmul.f32 %v1263_v48, %v1259_v46  ;;  %v1884_v46 = vsel %vm1398_vm4, 1.0, %v3032_v4 }
 0xffe   :  { %v3481_v51 = vadd.f32 %v1265_v49, %v1264_v50  ;;  %v1515_v49 = vld [vmem:[%s3706_s4] sm:$0xff] }
0x1000   :  { %2945 = vtanh.f32 %v3481_v51 }
0x100a   :  { %v2946_v54 = vpop.eup %2945 }
0x100b   :  { %v1268_v58 = vmul.f32 %v2946_v54, %v1257_v44  ;;  %v1516_v54 = vld [vmem:[%s3706_s4 + $0x8] sm:$0xff] }
0x100d   :  { %v1269_v61 = vsel %vm3311_vm8, %v1268_v58, 0.0  ;;  %v1517_v58 = vld [vmem:[%s3706_s4 + $0x10] sm:$0xff] }
0x100e   :  { %v3487_v53 = vadd.f32 %v3215_v20, %v1269_v61  ;;  %v2822_v61 = vpack.c.bf16 %v1516_v54, %v1515_v49  ;;  %v1629_v49 = vstv %s1889_s30 }
0x1010   :  { %2403 = vmatmul.mubr.f32.vlgmr.msra.gmra.mrb[10].mxu1 %v3487_v53 }
0x1011   :  { %2472 = vmatprep.mubr.msk.f32.mxu1 %vm3031_vm0, %v3032_v4  ;;  %2823 = vmatpush3.bf16.msra.mxu1 %v2822_v61 }
0x1012   :  { %2824 = vmatprep.subr.bf16.mxu1 %v3030_v3 }
0x10e3   :  { %v3492_v1 = vpop.f32.mrb[10].mxu1 }
0x10e4   :  { %v2404_v55 = vpop.f32.mrb[11].mxu1  ;;  %v1369_v7 = vsel %vm643_vm9, %v3492_v1, -inf }
0x10e5   :  { %1370 = vmax.xlane.f32.xlu1 %v1369_v7 }
0x1172   :  { %v1371_v10 = vpop.xlane.xlu1 %1370 }
0x1173   :  { %vm1372_vm2 = vcmp.eq.f32.partialorder %v3492_v1, %v1371_v10 }
0x1174   :  { %v1373_v57 = vsel %vm1372_vm2, %v3209_v14, 64 }
0x1175   :  { %v1374_v59 = vsel %vm643_vm9, %v1373_v57, 2147483647 }
0x1176   :  { %v1376_v60 = vshra.s32 %v1374_v59, 16  ;;  %v1375_v21 = vand.u32 65535, %v1374_v59 }
0x1178   :  { %v1378_v62 = vcvt.s32.f32 %v1376_v60  ;;  %v1377_v0 = vcvt.s32.f32 %v1375_v21  ;;  %v1519_v60 = vld [vmem:[%s3706_s4 + $0x20] sm:$0xff]  ;;  %v1530_v21 = vld [vmem:[%s3706_s4 + $0x78] sm:$0xff] }
0x117a   :  { %1379 = vmin.xlane.f32.xlu0 %v1378_v62 }
0x1207   :  { %v1380_v22 = vpop.xlane.xlu0 %1379 }
0x1208   :  { %vm1381_vm3 = vcmp.eq.f32.partialorder %v1378_v62, %v1380_v22  ;;  %v1386_v36 = vcvt.f32.s32 %v1380_v22  ;;  %v1520_v62 = vld [vmem:[%s3706_s4 + $0x28] sm:$0xff] }
0x1209   :  { %v1382_v23 = vsel %vm1381_vm3, %v1377_v0, inf  ;;  %v2828_v6 = vpack.c.bf16 %v1520_v62, %v1519_v60 }
0x120a   :  { %1383 = vmin.xlane.f32.xlu0 %v1382_v23  ;;  %v1387_v40 = vshll.u32 %v1386_v36, 16 }
0x1297   :  { %v1384_v39 = vpop.xlane.xlu0 %1383 }
0x1298   :  { %v1385_v43 = vcvt.f32.s32 %v1384_v39 }
0x129a   :  { %v1388_v44 = vadd.s32 %v1387_v40, %v1385_v43 }
0x129c   :  { %vm1389_vm7 = vcmp.eq.s32.totalorder %v3209_v14, %v1388_v44 }
0x129d   :  { %v1881_v47 = vsel %vm1389_vm7, 1.0, %v3032_v4 }
0x129e   :  { %v1406_v48 = vsel %vm1405_vm6, %v1884_v46, %v1881_v47 }
0x129f   :  { %v1407_v50 = vadd.f32 %v1406_v48, %v3487_v53  ;;  %v1518_v53 = vld [vmem:[%s3706_s4 + $0x18] sm:$0xff] }
0x12a0   :  { %v2825_v55 = vpack.c.bf16 %v1518_v53, %v1517_v58 }
0x12a1   :  { %2438 = vmatmul.mubr.f32.vlgmr.msra.gmra.mrb[6].mxu0 %v1407_v50 }
0x12a2   :  { %2847 = vmatpush3.bf16.msra.mxu0 %v3508_v11  ;;  %2507 = vmatprep.mubr.msk.f32.mxu0 %vm3031_vm0, %v3032_v4  ;;  %v1522_v11 = vld [vmem:[%s3706_s4 + $0x38] sm:$0xff] }
0x12a3   :  { %2848 = vmatprep.subr.bf16.mxu0 %v3030_v3  ;;  %2826 = vmatpush3.bf16.msra.mxu1 %v2825_v55  ;;  %v2831_v25 = vpack.c.bf16 %v1522_v11, %v1521_v9 }
0x12a4   :  { %2827 = vmatprep.subr.bf16.mxu1 %v3030_v3 }
0x12a6   :  { %2850 = vmatpush3.bf16.msra.mxu0 %v3514_v27  ;;  %v1523_v27 = vld [vmem:[%s3706_s4 + $0x40] sm:$0xff] }
0x12a7   :  { %2851 = vmatprep.subr.bf16.mxu0 %v3030_v3  ;;  %2829 = vmatpush3.bf16.msra.mxu1 %v2828_v6  ;;  %v2834_v38 = vpack.c.bf16 %v1524_v35, %v1523_v27 }
0x12a8   :  { %2830 = vmatprep.subr.bf16.mxu1 %v3030_v3 }
0x12aa   :  { %2853 = vmatpush3.bf16.msra.mxu0 %v2804_v41  ;;  %v1525_v41 = vld [vmem:[%s3706_s4 + $0x50] sm:$0xff] }
0x12ab   :  { %2854 = vmatprep.subr.bf16.mxu0 %v3030_v3  ;;  %2832 = vmatpush3.bf16.msra.mxu1 %v2831_v25 }
0x12ac   :  { %2833 = vmatprep.subr.bf16.mxu1 %v3030_v3 }
0x12ae   :  { %2856 = vmatpush3.bf16.msra.mxu0 %v2807_v12  ;;  %v2837_v12 = vpack.c.bf16 %v1526_v45, %v1525_v41 }
0x12af   :  { %2857 = vmatprep.subr.bf16.mxu0 %v3030_v3  ;;  %2835 = vmatpush3.bf16.msra.mxu1 %v2834_v38 }
0x12b0   :  { %2836 = vmatprep.subr.bf16.mxu1 %v3030_v3 }
0x12b2   :  { %2859 = vmatpush3.bf16.msra.mxu0 %v2810_v15  ;;  %v1528_v15 = vld [vmem:[%s3706_s4 + $0x68] sm:$0xff] }
0x12b3   :  { %2860 = vmatprep.subr.bf16.mxu0 %v3030_v3  ;;  %2838 = vmatpush3.bf16.msra.mxu1 %v2837_v12  ;;  %v2840_v18 = vpack.c.bf16 %v1528_v15, %v1527_v56 }
0x12b4   :  { %2839 = vmatprep.subr.bf16.mxu1 %v3030_v3 }
0x12b6   :  { %2862 = vmatpush3.bf16.msra.mxu0 %v2813_v19  ;;  %v1529_v19 = vld [vmem:[%s3706_s4 + $0x70] sm:$0xff]  ;;  %s1888_s4 = sld [smem:[#allocation3 + $0xe]] }
0x12b7   :  { %2863 = vmatprep.subr.bf16.mxu0 %v3030_v3  ;;  %2841 = vmatpush3.bf16.msra.mxu1 %v2840_v18  ;;  %v2843_v22 = vpack.c.bf16 %v1530_v21, %v1529_v19 }
0x12b8   :  { %2842 = vmatprep.subr.bf16.mxu1 %v3030_v3 }
0x12ba   :  { %2865 = vmatpush3.bf16.msra.mxu0 %v2816_v28 }
0x12bb   :  { %2866 = vmatprep.subr.bf16.mxu0 %v3030_v3  ;;  %2844 = vmatpush3.bf16.msra.mxu1 %v2843_v22 }
0x12bc   :  { %2869 = vmatprep.subr.bf16.mxu1 %v3030_v3  ;;  %v1626_v48 = vstv %s1888_s4 }
0x12bd   :  { %v1627_v50 = vsel %vm668_vm12, %v1626_v48, 0  ;;  %vm890_vm12 = vcmask 1041920  }
0x12be   :  { %2868 = vmatpush3.bf16.msra.mxu0 %v2819_v31  ;;  %v1630_v58 = vsel %vm672_vm13, %v1629_v49, %v1627_v50 }
0x1374   :  { %v1490_v7 = vpop.f32.mrb[6].mxu0 }
0x1375   :  { %v1886_v10 = vmul.f32 -1.442695, %v1490_v7  ;;  %v2439_v57 = vpop.f32.mrb[7].mxu0 }
0x1377   :  { %2947 = vpow2.f32 %v1886_v10 }
0x1378   :  { %2949 = vtanh.f32 %v1490_v7 }
0x1381   :  { %v2948_v59 = vpop.eup %2947 }
0x1382   :  { %v1498_v63 = vadd.f32 1.0, %v2948_v59  ;;  %v2950_v52 = vpop.eup %2949 }
0x1384   :  { %2951 = vrcp.f32 %v1498_v63 }
0x138e   :  { %v2952_v13 = vpop.eup %2951 }
0x138f   :  { %v1501_v17 = vsel %vm535_vm5, %v2950_v52, %v2952_v13 }
0x1390   :  { %1504 = vrot.lane.b32.xlu0 %v1501_v17, %s3035_s25  ;;  %1502 = vrot.lane.b32.xlu1 %v1501_v17, %s3034_s18 }
0x1394   :  { %1506 = vrot.lane.b32.xlu1 %v1501_v17, %s3033_s28 }
0x1402   :  { %v1503_v0 = vpop.permute.xlu1 %1502  ;;  %v1505_v23 = vpop.permute.xlu0 %1504 }
0x1403   :  { %v1508_v26 = vmul.f32 %v1505_v23, %v3481_v51 }
0x1406   :  { %v1507_v24 = vpop.permute.xlu1 %1506 }
0x1407   :  { %v1509_v28 = vmul.f32 %v1507_v24, %v1503_v0 }
0x1409   :  { %v3643_v29 = vadd.f32 %v1509_v28, %v1508_v26 }
0x140b   :  { %2953 = vtanh.f32 %v3643_v29 }
0x1415   :  { %v2954_v30 = vpop.eup %2953 }
0x1416   :  { %v1512_v31 = vmul.f32 %v2954_v30, %v1501_v17 }
0x1418   :  { %v1513_v32 = vsel %vm3311_vm8, %v1512_v31, 0.0 }
0x1419   :  { %v1514_v33 = vadd.f32 %v3215_v20, %v1513_v32 }
0x141b   :  { %2473 = vmatmul.mubr.f32.vlgmr.msra.gmra.mrb[12].mxu1 %v1514_v33 }
0x141c   :  { %2871 = vmatpush3.bf16.msra.mxu1 %v2822_v61  ;;  %2542 = vmatprep.mubr.msk.f32.mxu1 %vm3031_vm0, %v3032_v4 }
0x141d   :  { %2872 = vmatprep.subr.bf16.mxu1 %v3030_v3 }
0x1420   :  { %2874 = vmatpush3.bf16.msra.mxu1 %v2825_v55  ;;  %v1637_v55 = vstv %s1636_s6 }
0x1421   :  { %2875 = vmatprep.subr.bf16.mxu1 %v3030_v3  ;;  %vm1638_vm11 = vcmp.eq.s32.totalorder %v1637_v55, 1 }
0x1424   :  { %2877 = vmatpush3.bf16.msra.mxu1 %v2828_v6 }
0x1425   :  { %2878 = vmatprep.subr.bf16.mxu1 %v3030_v3 }
0x1428   :  { %2880 = vmatpush3.bf16.msra.mxu1 %v2831_v25 }
0x1429   :  { %2881 = vmatprep.subr.bf16.mxu1 %v3030_v3 }
0x142c   :  { %2883 = vmatpush3.bf16.msra.mxu1 %v2834_v38  ;;  %v886_v38 = vrot.slane %v3398_v2, %v3089_v16 }
0x142d   :  { %2884 = vmatprep.subr.bf16.mxu1 %v3030_v3 }
0x1430   :  { %2886 = vmatpush3.bf16.msra.mxu1 %v2837_v12 }
0x1431   :  { %2887 = vmatprep.subr.bf16.mxu1 %v3030_v3 }
0x1434   :  { %2889 = vmatpush3.bf16.msra.mxu1 %v2840_v18 }
0x1435   :  { %2890 = vmatprep.subr.bf16.mxu1 %v3030_v3 }
0x1438   :  { %2892 = vmatpush3.bf16.msra.mxu1 %v2843_v22 }
0x14ee   :  { %v1597_v51 = vpop.f32.mrb[12].mxu1 }
0x14ef   :  { %1601 = vst.msk [vmem:[#allocation7 + $0x4] sm:$0x3] %vm643_vm9, %v1597_v51  ;;  %v2474_v34 = vpop.f32.mrb[13].mxu1  ;;  %v1602_v36 = vsel %vm643_vm9, %v1597_v51, -inf }
0x14f0   :  { %1603 = vmax.xlane.f32.xlu1 %v1602_v36 }
0x157d   :  { %v1604_v37 = vpop.xlane.xlu1 %1603 }
0x157e   :  { %vm1605_vm0 = vcmp.eq.f32.partialorder %v1597_v51, %v1604_v37 }
0x157f   :  { %v1606_v39 = vsel %vm1605_vm0, %v3209_v14, 64 }
0x1580   :  { %v1607_v40 = vsel %vm643_vm9, %v1606_v39, 2147483647  ;;  %vm1631_vm9 = vcmp.eq.s32.totalorder %v3209_v14, %v1630_v58 }
0x1581   :  { %v1609_v42 = vshra.s32 %v1607_v40, 16  ;;  %v1608_v44 = vand.u32 65535, %v1607_v40  ;;  %v1890_v57 = vsel %vm1631_vm9, 1.0, %v3032_v4 }
0x1583   :  { %v1611_v43 = vcvt.s32.f32 %v1609_v42  ;;  %v1610_v3 = vcvt.s32.f32 %v1608_v44 }
0x1585   :  { %1612 = vmin.xlane.f32.xlu0 %v1611_v43 }
0x1612   :  { %v1613_v46 = vpop.xlane.xlu0 %1612 }
0x1613   :  { %vm1614_vm10 = vcmp.eq.f32.partialorder %v1611_v43, %v1613_v46  ;;  %v1619_v54 = vcvt.f32.s32 %v1613_v46 }
0x1614   :  { %v1615_v47 = vsel %vm1614_vm10, %v1610_v3, inf }
0x1615   :  { %1616 = vmin.xlane.f32.xlu0 %v1615_v47  ;;  %v1620_v53 = vshll.u32 %v1619_v54, 16 }
0x16a2   :  { %v1617_v61 = vpop.xlane.xlu0 %1616 }
0x16a3   :  { %v1618_v7 = vcvt.f32.s32 %v1617_v61 }
0x16a5   :  { %v1621_v10 = vadd.s32 %v1620_v53, %v1618_v7 }
0x16a7   :  { %vm1622_vm14 = vcmp.eq.s32.totalorder %v3209_v14, %v1621_v10 }
0x16a8   :  { %v1887_v59 = vsel %vm1622_vm14, 1.0, %v3032_v4  ;;  %v1364_v4 = vrot.slane %v3492_v1, %v3089_v16 }
0x16a9   :  { %v1639_v60 = vsel %vm1638_vm11, %v1890_v57, %v1887_v59 }
0x16aa   :  { %v1640_v62 = vadd.f32 %v1639_v60, %v1514_v33 }
0x16ac   :  { %2508 = vmatmul.mubr.f32.vlgmr.msra.gmra.mrb[8].mxu0 %v1640_v62 }
0x177f   :  { %v1723_v63 = vpop.f32.mrb[8].mxu0 }
0x1780   :  { %v1892_v5 = vmul.f32 -1.442695, %v1723_v63  ;;  %v2509_v6 = vpop.f32.mrb[9].mxu0 }
0x1782   :  { %2955 = vpow2.f32 %v1892_v5 }
0x1783   :  { %2957 = vtanh.f32 %v1723_v63 }
0x178c   :  { %v2956_v9 = vpop.eup %2955 }
0x178d   :  { %v1731_v11 = vadd.f32 1.0, %v2956_v9  ;;  %v2958_v25 = vpop.eup %2957 }
0x178f   :  { %2959 = vrcp.f32 %v1731_v11 }
0x1799   :  { %v2960_v27 = vpop.eup %2959 }
0x179a   :  { %v1734_v35 = vsel %vm535_vm5, %v2958_v25, %v2960_v27 }
0x179b   :  { %1737 = vrot.lane.b32.xlu0 %v1734_v35, %s3035_s25  ;;  %1735 = vrot.lane.b32.xlu1 %v1734_v35, %s3034_s18 }
0x179f   :  { %1365 = vrot.lane.b32.xlu0 %v1364_v4, %s3034_s18  ;;  %1739 = vrot.lane.b32.xlu1 %v1734_v35, %s3033_s28  ;;  %s3036_s28 = smov [#allocation7]  }
0x17a0   :  { %s1852_s25 = sshll.u32 %s3036_s28, 4  ;;  %s1853_s25 = int_to_ptr.vmem [resolvable:$true] %s1852_s25 }
0x17a1   :  { %s2997_s7 = scalar_lea.vmem %s1853_s25, 96  ;;  %p3002_p5 = scmp.lt.s32.totalorder %s1853_s25, %s1853_s25 }
0x17a2   :  { %p2998_p4 = scmp.ne.s32.totalorder %s1853_s25, %s2997_s7  ;;  %p3003_p6 = scmp.lt.s32.totalorder %s2997_s7, %s2997_s7 }
0x17a3   :  { %887 = vrot.lane.b32.xlu1 %v886_v38, %s3034_s18 }
0x17a4   :  { %p3004_p7 = por %p3003_p6, %p3002_p5 }
0x17a6   :  { %p3005_p8 = pnand %p3004_p7, %p2998_p4 }
0x180d   :  { %v1738_v41 = vpop.permute.xlu0 %1737  ;;  %v1736_v45 = vpop.permute.xlu1 %1735 }
0x180e   :  { %v1741_v12 = vmul.f32 %v1738_v41, %v3643_v29 }
0x1811   :  { %v1366_v14 = vpop.permute.xlu0 %1365  ;;  %v1740_v52 = vpop.permute.xlu1 %1739 }
0x1812   :  { %1368 = vst.msk [vmem:[#allocation7 + $0x2] sm:$0x3] %vm890_vm12, %v1366_v14  ;;  %v1742_v13 = vmul.f32 %v1740_v52, %v1736_v45 }
0x1814   :  { %v1743_v1 = vadd.f32 %v1742_v13, %v1741_v12 }
0x1815   :  { %v888_v56 = vpop.permute.xlu1 %887 }
0x1816   :  { %2961 = vtanh.f32 %v1743_v1  ;;  %891 = vst.msk [vmem:[#allocation7] sm:$0x3] %vm890_vm12, %v888_v56 }
0x1820   :  { %v2962_v15 = vpop.eup %2961 }
0x1821   :  { %v1745_v17 = vmul.f32 %v2962_v15, %v1734_v35 }
0x1823   :  { %v1746_v2 = vsel %vm3311_vm8, %v1745_v17, 0.0 }
0x1824   :  { %v1747_v18 = vadd.f32 %v3215_v20, %v1746_v2 }
0x1826   :  { %2543 = vmatmul.mubr.f32.vlgmr.msra.gmra.mrb[14].mxu1 %v1747_v18 }
0x18f9   :  { %v1830_v19 = vpop.f32.mrb[14].mxu1 }
0x18fa   :  { %v1841_v21 = vrot.slane %v1830_v19, %v3089_v16  ;;  %v2544_v22 = vpop.f32.mrb[15].mxu1 }
0x18fc   :  { %1842 = vrot.lane.b32.xlu1 %v1841_v21, %s3034_s18 }
0x196e   :  { %v1843_v0 = vpop.permute.xlu1 %1842 }
0x196f   :  { %1845 = vst.msk [vmem:[#allocation7 + $0x4] sm:$0x3] %vm890_vm12, %v1843_v0 }
0x1970   :  { %3008 = shalt.err (!%p3005_p8)
}
0x1971   :  { %s3009_s10 = scalar_lea.hbm %s3707_s5, 96 }
0x1972   :  { %p3010_p9 = scmp.ne.s32.totalorder %s3707_s5, %s3009_s10  ;;  %p3013_p10 = scmp.lt.u32.totalorder %s3009_s10, %s3707_s5 }
0x1974   :  { %p3015_p11 = pnand %p3013_p10, %p3010_p9 }
0x1976   :  { %3018 = shalt.err (!%p3015_p11)
}
0x1977   :  { %1855 = dma.vmem_to_hbm [thread:$0]  %s1853_s25, 96, %s3707_s5, [#allocation6]  }
0x1978   :  { %3023 = dma.done.wait [#allocation6], 96  }
0x1979   :  { %3024 = vsyncadd [#allocation6], 4294967200 }
0x197a   :  { %1859 = vsyncpa [#allocation5], 1 }
0x197b   :  { %1860 = vsyncpa [#allocation6], 1 }

</bundles_post_ra>
